<compile_context>
chip_gen: v6e
topology: v6e:2x2x1
jax: 0.10.0
libtpu: 0.0.40
codegen_flags: <defaults>
</compile_context>

<pallas_src>
import math
import functools

import jax
import jax.numpy as jnp
from jax.experimental import pallas as pl
from jax.experimental.pallas import tpu as pltpu


# ---------------------------------------------------------------------------
# Model config (small, TPU-tile friendly stand-in for real DistilBERT dims)
# ---------------------------------------------------------------------------
VOCAB = 100
MAX_POS = 32
H = 128          # hidden size (stand-in for 768)
N_HEADS = 4
D_HEAD = H // N_HEADS
FFN = 256        # stand-in for 3072
N_LAYERS = 2     # stand-in for 6
NUM_REL = 8
LN_EPS = 1e-12
ROW_TILE = 512   # row tile for the standalone LN kernel (HBM-bound regime)


def _gelu(x):
    # TODO(synk): tanh approximation; HF DistilBERT uses exact erf GELU.
    c = math.sqrt(2.0 / math.pi)
    return 0.5 * x * (1.0 + jnp.tanh(c * (x + 0.044715 * x * x * x)))


def _ln(y, g, b):
    mu = jnp.mean(y, axis=-1, keepdims=True)
    var = jnp.mean((y - mu) ** 2, axis=-1, keepdims=True)
    return (y - mu) * jax.lax.rsqrt(var + LN_EPS) * g + b


def _row_tile(M):
    """Row tile: multiple of 8, capped at ROW_TILE, and >=2 grid steps when
    possible so v7x's 2 TensorCores both get work (harmless on v5e/v6e)."""
    if M <= 8:
        return M
    half = -(-M // 2)                     # cdiv(M, 2)
    tm = ((half + 7) // 8) * 8
    return min(tm, ROW_TILE, M)


# ---------------------------------------------------------------------------
# Pallas kernels
# ---------------------------------------------------------------------------
def _layer_norm_kernel(x_ref, g_ref, b_ref, o_ref):
    y = x_ref[...].astype(jnp.float32)
    o_ref[...] = _ln(y, g_ref[...], b_ref[...]).astype(o_ref.dtype)


def layer_norm(x, gamma, beta):
    """x: (M, H) row-wise LayerNorm, row-tiled."""
    M, Hd = x.shape
    tm = _row_tile(M)
    return pl.pallas_call(
        _layer_norm_kernel,
        out_shape=jax.ShapeDtypeStruct((M, Hd), jnp.float32),
        grid=(pl.cdiv(M, tm),),
        in_specs=[
            pl.BlockSpec((tm, Hd), lambda i: (i, 0)),
            pl.BlockSpec((1, Hd), lambda i: (0, 0)),
            pl.BlockSpec((1, Hd), lambda i: (0, 0)),
        ],
        out_specs=pl.BlockSpec((tm, Hd), lambda i: (i, 0)),
        compiler_params=pltpu.CompilerParams(dimension_semantics=("parallel",)),
    )(x, gamma.reshape(1, Hd), beta.reshape(1, Hd))


def _encoder_layer_kernel(x_ref, bias_ref, wqkv_ref, bqkv_ref, wo_ref, bo_ref,
                          ln1g_ref, ln1b_ref, w1_ref, b1_ref, w2_ref, b2_ref,
                          ln2g_ref, ln2b_ref, o_ref, *, n_heads, d_head, scale):
    """One full transformer block for one batch element, entirely in VMEM.

    QKV projection + multi-head attention + Wo + residual + LN1 + FFN
    (W1+bias+GELU, W2+bias+residual+LN2).  bf16 MXU operands, f32 accumulation
    and f32 softmax/LN/residual math.
    """
    x = x_ref[0].astype(jnp.float32)                       # (S, H) residual path
    xb = x.astype(jnp.bfloat16)
    bias = bias_ref[0]                                     # (1, S) additive key-mask bias

    # --- fused QKV projection: three lane-dense (S, H) slabs ---
    q = jnp.dot(xb, wqkv_ref[0].astype(jnp.bfloat16),
                preferred_element_type=jnp.float32) + bqkv_ref[0].astype(jnp.float32)
    k = jnp.dot(xb, wqkv_ref[1].astype(jnp.bfloat16),
                preferred_element_type=jnp.float32) + bqkv_ref[1].astype(jnp.float32)
    v = jnp.dot(xb, wqkv_ref[2].astype(jnp.bfloat16),
                preferred_element_type=jnp.float32) + bqkv_ref[2].astype(jnp.float32)

    # --- per-head attention (static unroll); ctx heads land at static lane
    #     offsets of one (S, H) slab so Wo is a single K=128 matmul ---
    ctxs = []
    for h in range(n_heads):
        lo = h * d_head
        qh = q[:, lo:lo + d_head].astype(jnp.bfloat16)
        kh = k[:, lo:lo + d_head].astype(jnp.bfloat16)
        vh = v[:, lo:lo + d_head].astype(jnp.bfloat16)
        # QK^T (contract last dims, no explicit transpose), f32 score path
        s = jax.lax.dot_general(qh, kh, (((1,), (1,)), ((), ())),
                                preferred_element_type=jnp.float32)
        s = s * scale + bias
        s = s - jnp.max(s, axis=-1, keepdims=True)
        p = jnp.exp(s)
        p = p * pl.reciprocal(jnp.sum(p, axis=-1, keepdims=True), approx=True)
        ctxs.append(jnp.dot(p.astype(jnp.bfloat16), vh,
                            preferred_element_type=jnp.float32))
    ctx = jnp.concatenate(ctxs, axis=-1)                   # (S, H) lane-dense

    # --- Wo projection + residual + sa_layer_norm ---
    y = jnp.dot(ctx.astype(jnp.bfloat16), wo_ref[...].astype(jnp.bfloat16),
                preferred_element_type=jnp.float32)
    y = y + bo_ref[...].astype(jnp.float32) + x
    h1 = _ln(y, ln1g_ref[...], ln1b_ref[...])              # (S, H) f32

    # --- FFN: W1 + bias + GELU, W2 + bias + residual + output_layer_norm ---
    f = jnp.dot(h1.astype(jnp.bfloat16), w1_ref[...].astype(jnp.bfloat16),
                preferred_element_type=jnp.float32)
    f = _gelu(f + b1_ref[...].astype(jnp.float32))         # (S, FFN) f32 (VMEM only)
    y2 = jnp.dot(f.astype(jnp.bfloat16), w2_ref[...].astype(jnp.bfloat16),
                 preferred_element_type=jnp.float32)
    y2 = y2 + b2_ref[...].astype(jnp.float32) + h1
    o_ref[0] = _ln(y2, ln2g_ref[...], ln2b_ref[...]).astype(o_ref.dtype)


def encoder_layer(x, mask_bias, layer):
    """x: (B, S, H) f32; mask_bias: (B, 1, S) f32 -> (B, S, H) f32."""
    B, S, Hd = x.shape
    kernel = functools.partial(_encoder_layer_kernel, n_heads=N_HEADS,
                               d_head=D_HEAD, scale=1.0 / math.sqrt(D_HEAD))
    return pl.pallas_call(
        kernel,
        out_shape=jax.ShapeDtypeStruct((B, S, Hd), jnp.float32),
        grid=(B,),
        in_specs=[
            pl.BlockSpec((1, S, Hd), lambda b: (b, 0, 0)),       # x
            pl.BlockSpec((1, 1, S), lambda b: (b, 0, 0)),        # mask bias
            pl.BlockSpec((3, Hd, Hd), lambda b: (0, 0, 0)),      # wqkv
            pl.BlockSpec((3, 1, Hd), lambda b: (0, 0, 0)),       # bqkv
            pl.BlockSpec((Hd, Hd), lambda b: (0, 0)),            # wo
            pl.BlockSpec((1, Hd), lambda b: (0, 0)),             # bo
            pl.BlockSpec((1, Hd), lambda b: (0, 0)),             # ln1 gamma
            pl.BlockSpec((1, Hd), lambda b: (0, 0)),             # ln1 beta
            pl.BlockSpec((Hd, FFN), lambda b: (0, 0)),           # w1
            pl.BlockSpec((1, FFN), lambda b: (0, 0)),            # b1
            pl.BlockSpec((FFN, Hd), lambda b: (0, 0)),           # w2
            pl.BlockSpec((1, Hd), lambda b: (0, 0)),             # b2
            pl.BlockSpec((1, Hd), lambda b: (0, 0)),             # ln2 gamma
            pl.BlockSpec((1, Hd), lambda b: (0, 0)),             # ln2 beta
        ],
        out_specs=pl.BlockSpec((1, S, Hd), lambda b: (b, 0, 0)),
        compiler_params=pltpu.CompilerParams(dimension_semantics=("parallel",)),
    )(x, mask_bias,
      layer["wqkv"], layer["bqkv"],
      layer["wo"], layer["bo"].reshape(1, Hd),
      layer["ln1_g"].reshape(1, Hd), layer["ln1_b"].reshape(1, Hd),
      layer["w1"], layer["b1"].reshape(1, FFN),
      layer["w2"], layer["b2"].reshape(1, Hd),
      layer["ln2_g"].reshape(1, Hd), layer["ln2_b"].reshape(1, Hd))


# ---------------------------------------------------------------------------
# Parameter init (deterministic, synthetic). Matmul weights stored in bf16
# (halves weight DMA bytes); biases / LN params / embeddings in f32.
# ---------------------------------------------------------------------------
def init_params(key):
    def nrm(k, shape, std=0.02, dtype=jnp.bfloat16):
        return (jax.random.normal(k, shape, dtype=jnp.float32) * std).astype(dtype)

    keys = jax.random.split(key, 4 + N_LAYERS)
    params = {
        "word_emb": nrm(keys[0], (VOCAB, H), dtype=jnp.float32),
        "pos_emb": nrm(keys[1], (MAX_POS, H), dtype=jnp.float32),
        "emb_ln_g": jnp.ones((H,), jnp.float32),
        "emb_ln_b": jnp.zeros((H,), jnp.float32),
        "l2_w": nrm(keys[2], (H, H), dtype=jnp.float32),
        "l2_b": jnp.zeros((H,), jnp.float32),
        "l4_w": nrm(keys[3], (H, NUM_REL), dtype=jnp.float32),
        "l4_b": jnp.zeros((NUM_REL,), jnp.float32),
        "layers": [],
    }
    for li in range(N_LAYERS):
        lk = jax.random.split(keys[4 + li], 4)
        params["layers"].append({
            # fused QKV projection stored as (3, H, H): [Wq, Wk, Wv]
            "wqkv": nrm(lk[0], (3, H, H)),
            "bqkv": jnp.zeros((3, 1, H), jnp.float32),
            "wo": nrm(lk[1], (H, H)), "bo": jnp.zeros((H,), jnp.float32),
            "ln1_g": jnp.ones((H,), jnp.float32), "ln1_b": jnp.zeros((H,), jnp.float32),
            "w1": nrm(lk[2], (H, FFN)), "b1": jnp.zeros((FFN,), jnp.float32),
            "w2": nrm(lk[3], (FFN, H)), "b2": jnp.zeros((H,), jnp.float32),
            "ln2_g": jnp.ones((H,), jnp.float32), "ln2_b": jnp.zeros((H,), jnp.float32),
        })
    return params


# ---------------------------------------------------------------------------
# Forward pass (mirrors DistilBERTClass.forward)
# ---------------------------------------------------------------------------
def distilbert_class_forward(params, input_ids, attention_mask, token_type_ids):
    # token_type_ids is accepted but unused by DistilBERT (matches reference call).
    del token_type_ids
    B, S = input_ids.shape
    # Additive key-mask bias, computed once (hoisted out of the attention grid).
    # Kept in f32 (-1e9 would saturate in bf16; the score path stays f32).
    mask_bias = ((1.0 - attention_mask.astype(jnp.float32)) * (-1e9)).reshape(B, 1, S)

    # --- l1: DistilBERT encoder ---
    # Embedding gather is JAX glue; embedding LayerNorm in Pallas (row-tiled).
    h = jnp.take(params["word_emb"], input_ids, axis=0) + params["pos_emb"][None, :S, :]
    h = layer_norm(h.reshape(B * S, H), params["emb_ln_g"], params["emb_ln_b"])
    # TODO(synk): embedding dropout is identity (inference mode)

    h = h.reshape(B, S, H)
    for layer in params["layers"]:
        # Whole transformer block in ONE pallas_call (QKV + attention + Wo +
        # residual + LN1 + FFN + residual + LN2), per-batch lane-dense blocks.
        h = encoder_layer(h, mask_bias, layer)

    hidden_state = h                                                   # (B, S, H)

    # --- head (tiny, left to plain XLA: a (B,128) pallas_call is pure launch
    #     overhead and an 8-lane output block would force masked stores) ---
    pooler = hidden_state[:, 0]                                        # (B, H)  (CLS token)
    pooler = jnp.tanh(jnp.dot(pooler, params["l2_w"]) + params["l2_b"])  # l2 + Tanh
    # TODO(synk): l3 Dropout implemented as identity (inference-mode semantics)
    output = jnp.dot(pooler, params["l4_w"]) + params["l4_b"]          # l4 -> (B, NUM_REL)
    return output


# ---------------------------------------------------------------------------
if __name__ == "__main__":
    B, S = 2, 8
    key = jax.random.PRNGKey(0)
    k_param, k_ids, k_mask = jax.random.split(key, 3)

    params = init_params(k_param)
    input_ids = jax.random.randint(k_ids, (B, S), 0, VOCAB, dtype=jnp.int32)
    attention_mask = jnp.ones((B, S), dtype=jnp.int32).at[1, S - 2:].set(0)  # pad tail of batch 1
    token_type_ids = jnp.zeros((B, S), dtype=jnp.int32)

    fwd = jax.jit(distilbert_class_forward)
    out = fwd(params, input_ids, attention_mask, token_type_ids)
    out = jax.block_until_ready(out)
    assert out.shape == (B, NUM_REL)
    print("KERNEL_OK")
</pallas_src>

<mosaic_0001>
module attributes {stable_mosaic.version = 11 : i64} {
  func.func @_layer_norm_kernel(%arg0: i32, %arg1: memref<8x128xf32, #tpu.memory_space<vmem>>, %arg2: memref<1x128xf32, #tpu.memory_space<vmem>>, %arg3: memref<1x128xf32, #tpu.memory_space<vmem>>, %arg4: memref<8x128xf32, #tpu.memory_space<vmem>>) attributes {dimension_semantics = [#tpu.dimension_semantics<parallel>], iteration_bounds = array<i64: 2>, scalar_prefetch = 0 : i64, scratch_operands = 0 : i64, tpu.core_type = #tpu.core_type<tc>, window_params = [{transform_indices = @transform_0, window_bounds = array<i64: 8, 128>}, {pipeline_mode = #tpu.pipeline_mode<synchronous>, transform_indices = @transform_1, window_bounds = array<i64: 1, 128>}, {pipeline_mode = #tpu.pipeline_mode<synchronous>, transform_indices = @transform_2, window_bounds = array<i64: 1, 128>}, {transform_indices = @transform_3, window_bounds = array<i64: 8, 128>}]} {
    %c0 = arith.constant 0 : index
    %c0_0 = arith.constant 0 : index
    %0 = vector.load %arg1[%c0, %c0_0] : memref<8x128xf32, #tpu.memory_space<vmem>>, vector<8x128xf32>
    %c0_1 = arith.constant 0 : index
    %c0_2 = arith.constant 0 : index
    %1 = vector.load %arg2[%c0_1, %c0_2] : memref<1x128xf32, #tpu.memory_space<vmem>>, vector<1x128xf32>
    %c0_3 = arith.constant 0 : index
    %c0_4 = arith.constant 0 : index
    %2 = vector.load %arg3[%c0_3, %c0_4] : memref<1x128xf32, #tpu.memory_space<vmem>>, vector<1x128xf32>
    %cst = arith.constant dense<0.000000e+00> : vector<8xf32>
    %3 = vector.multi_reduction <add>, %0, %cst [1] : vector<8x128xf32> to vector<8xf32>
    %4 = vector.shape_cast %3 : vector<8xf32> to vector<8x1xf32>
    %cst_5 = arith.constant 1.280000e+02 : f32
    %5 = vector.broadcast %cst_5 : f32 to vector<8x1xf32>
    %6 = arith.divf %4, %5 : vector<8x1xf32>
    %7 = vector.broadcast %6 : vector<8x1xf32> to vector<8x128xf32>
    %8 = arith.subf %0, %7 : vector<8x128xf32>
    %9 = arith.mulf %8, %8 : vector<8x128xf32>
    %cst_6 = arith.constant dense<0.000000e+00> : vector<8xf32>
    %10 = vector.multi_reduction <add>, %9, %cst_6 [1] : vector<8x128xf32> to vector<8xf32>
    %11 = vector.shape_cast %10 : vector<8xf32> to vector<8x1xf32>
    %cst_7 = arith.constant 1.280000e+02 : f32
    %12 = vector.broadcast %cst_7 : f32 to vector<8x1xf32>
    %13 = arith.divf %11, %12 : vector<8x1xf32>
    %14 = vector.broadcast %6 : vector<8x1xf32> to vector<8x128xf32>
    %15 = arith.subf %0, %14 : vector<8x128xf32>
    %cst_8 = arith.constant 9.99999996E-13 : f32
    %16 = vector.broadcast %cst_8 : f32 to vector<8x1xf32>
    %17 = arith.addf %13, %16 : vector<8x1xf32>
    %18 = math.rsqrt %17 : vector<8x1xf32>
    %19 = vector.broadcast %18 : vector<8x1xf32> to vector<8x128xf32>
    %20 = arith.mulf %15, %19 : vector<8x128xf32>
    %21 = vector.broadcast %1 : vector<1x128xf32> to vector<8x128xf32>
    %22 = arith.mulf %20, %21 : vector<8x128xf32>
    %23 = vector.broadcast %2 : vector<1x128xf32> to vector<8x128xf32>
    %24 = arith.addf %22, %23 : vector<8x128xf32>
    %c0_9 = arith.constant 0 : index
    %c0_10 = arith.constant 0 : index
    %25 = vector.load %arg4[%c0_9, %c0_10] : memref<8x128xf32, #tpu.memory_space<vmem>>, vector<8x128xf32>
    tpu.vector_store %arg4[%c0_9, %c0_10], %24 {strides = array<i32>} : memref<8x128xf32, #tpu.memory_space<vmem>>, vector<8x128xf32>,
    return
  }
  func.func @transform_0(%arg0: i32) -> (i32, i32) {
    %c0_i32 = arith.constant 0 : i32
    %c0_i32_0 = arith.constant 0 : i32
    return %arg0, %c0_i32 : i32, i32
  }
  func.func @transform_1(%arg0: i32) -> (i32, i32) {
    %c0_i32 = arith.constant 0 : i32
    %c0_i32_0 = arith.constant 0 : i32
    %c0_i32_1 = arith.constant 0 : i32
    return %c0_i32, %c0_i32_0 : i32, i32
  }
  func.func @transform_2(%arg0: i32) -> (i32, i32) {
    %c0_i32 = arith.constant 0 : i32
    %c0_i32_0 = arith.constant 0 : i32
    %c0_i32_1 = arith.constant 0 : i32
    return %c0_i32, %c0_i32_0 : i32, i32
  }
  func.func @transform_3(%arg0: i32) -> (i32, i32) {
    %c0_i32 = arith.constant 0 : i32
    %c0_i32_0 = arith.constant 0 : i32
    return %arg0, %c0_i32 : i32, i32
  }
}

module attributes {stable_mosaic.version = 11 : i64} {
  func.func @_encoder_layer_kernel(%arg0: i32, %arg1: memref<1x8x128xf32, #tpu.memory_space<vmem>>, %arg2: memref<1x1x8xf32, #tpu.memory_space<vmem>>, %arg3: memref<3x128x128xbf16, #tpu.memory_space<vmem>>, %arg4: memref<3x1x128xf32, #tpu.memory_space<vmem>>, %arg5: memref<128x128xbf16, #tpu.memory_space<vmem>>, %arg6: memref<1x128xf32, #tpu.memory_space<vmem>>, %arg7: memref<1x128xf32, #tpu.memory_space<vmem>>, %arg8: memref<1x128xf32, #tpu.memory_space<vmem>>, %arg9: memref<128x256xbf16, #tpu.memory_space<vmem>>, %arg10: memref<1x256xf32, #tpu.memory_space<vmem>>, %arg11: memref<256x128xbf16, #tpu.memory_space<vmem>>, %arg12: memref<1x128xf32, #tpu.memory_space<vmem>>, %arg13: memref<1x128xf32, #tpu.memory_space<vmem>>, %arg14: memref<1x128xf32, #tpu.memory_space<vmem>>, %arg15: memref<1x8x128xf32, #tpu.memory_space<vmem>>) attributes {dimension_semantics = [#tpu.dimension_semantics<parallel>], iteration_bounds = array<i64: 2>, scalar_prefetch = 0 : i64, scratch_operands = 0 : i64, tpu.core_type = #tpu.core_type<tc>, window_params = [{transform_indices = @transform_0, window_bounds = array<i64: 1, 8, 128>}, {transform_indices = @transform_1, window_bounds = array<i64: 1, 1, 8>}, {pipeline_mode = #tpu.pipeline_mode<synchronous>, transform_indices = @transform_2, window_bounds = array<i64: 3, 128, 128>}, {pipeline_mode = #tpu.pipeline_mode<synchronous>, transform_indices = @transform_3, window_bounds = array<i64: 3, 1, 128>}, {pipeline_mode = #tpu.pipeline_mode<synchronous>, transform_indices = @transform_4, window_bounds = array<i64: 128, 128>}, {pipeline_mode = #tpu.pipeline_mode<synchronous>, transform_indices = @transform_5, window_bounds = array<i64: 1, 128>}, {pipeline_mode = #tpu.pipeline_mode<synchronous>, transform_indices = @transform_6, window_bounds = array<i64: 1, 128>}, {pipeline_mode = #tpu.pipeline_mode<synchronous>, transform_indices = @transform_7, window_bounds = array<i64: 1, 128>}, {pipeline_mode = #tpu.pipeline_mode<synchronous>, transform_indices = @transform_8, window_bounds = array<i64: 128, 256>}, {pipeline_mode = #tpu.pipeline_mode<synchronous>, transform_indices = @transform_9, window_bounds = array<i64: 1, 256>}, {pipeline_mode = #tpu.pipeline_mode<synchronous>, transform_indices = @transform_10, window_bounds = array<i64: 256, 128>}, {pipeline_mode = #tpu.pipeline_mode<synchronous>, transform_indices = @transform_11, window_bounds = array<i64: 1, 128>}, {pipeline_mode = #tpu.pipeline_mode<synchronous>, transform_indices = @transform_12, window_bounds = array<i64: 1, 128>}, {pipeline_mode = #tpu.pipeline_mode<synchronous>, transform_indices = @transform_13, window_bounds = array<i64: 1, 128>}, {transform_indices = @transform_14, window_bounds = array<i64: 1, 8, 128>}]} {
    %c0 = arith.constant 0 : index
    %c0_0 = arith.constant 0 : index
    %c0_1 = arith.constant 0 : index
    %0 = vector.load %arg1[%c0, %c0_0, %c0_1] : memref<1x8x128xf32, #tpu.memory_space<vmem>>, vector<1x8x128xf32>
    %1 = vector.shape_cast %0 : vector<1x8x128xf32> to vector<8x128xf32>
    %2 = arith.truncf %1 : vector<8x128xf32> to vector<8x128xbf16>
    %c0_2 = arith.constant 0 : index
    %c0_3 = arith.constant 0 : index
    %c0_4 = arith.constant 0 : index
    %3 = vector.load %arg2[%c0_2, %c0_3, %c0_4] : memref<1x1x8xf32, #tpu.memory_space<vmem>>, vector<1x1x8xf32>
    %4 = vector.shape_cast %3 : vector<1x1x8xf32> to vector<1x8xf32>
    %c0_5 = arith.constant 0 : index
    %c0_6 = arith.constant 0 : index
    %c0_7 = arith.constant 0 : index
    %5 = vector.load %arg3[%c0_5, %c0_6, %c0_7] : memref<3x128x128xbf16, #tpu.memory_space<vmem>>, vector<1x128x128xbf16>
    %6 = vector.shape_cast %5 : vector<1x128x128xbf16> to vector<128x128xbf16>
    %cst = arith.constant dense<0.000000e+00> : vector<8x128xf32>
    %7 = tpu.matmul %2, %6, %cst {dimension_numbers = #tpu.dot_dimension_numbers<[1], [0], [0], [1], [0, 0, 1, 1], [], []>} : vector<8x128xbf16>, vector<128x128xbf16>, vector<8x128xf32> -> vector<8x128xf32>
    %c0_8 = arith.constant 0 : index
    %c0_9 = arith.constant 0 : index
    %c0_10 = arith.constant 0 : index
    %8 = vector.load %arg4[%c0_8, %c0_9, %c0_10] : memref<3x1x128xf32, #tpu.memory_space<vmem>>, vector<1x1x128xf32>
    %9 = vector.shape_cast %8 : vector<1x1x128xf32> to vector<1x128xf32>
    %10 = vector.broadcast %9 : vector<1x128xf32> to vector<8x128xf32>
    %11 = arith.addf %7, %10 : vector<8x128xf32>
    %c1 = arith.constant 1 : index
    %c0_11 = arith.constant 0 : index
    %c0_12 = arith.constant 0 : index
    %12 = vector.load %arg3[%c1, %c0_11, %c0_12] : memref<3x128x128xbf16, #tpu.memory_space<vmem>>, vector<1x128x128xbf16>
    %13 = vector.shape_cast %12 : vector<1x128x128xbf16> to vector<128x128xbf16>
    %cst_13 = arith.constant dense<0.000000e+00> : vector<8x128xf32>
    %14 = tpu.matmul %2, %13, %cst_13 {dimension_numbers = #tpu.dot_dimension_numbers<[1], [0], [0], [1], [0, 0, 1, 1], [], []>} : vector<8x128xbf16>, vector<128x128xbf16>, vector<8x128xf32> -> vector<8x128xf32>
    %c1_14 = arith.constant 1 : index
    %c0_15 = arith.constant 0 : index
    %c0_16 = arith.constant 0 : index
    %15 = vector.load %arg4[%c1_14, %c0_15, %c0_16] : memref<3x1x128xf32, #tpu.memory_space<vmem>>, vector<1x1x128xf32>
    %16 = vector.shape_cast %15 : vector<1x1x128xf32> to vector<1x128xf32>
    %17 = vector.broadcast %16 : vector<1x128xf32> to vector<8x128xf32>
    %18 = arith.addf %14, %17 : vector<8x128xf32>
    %c2 = arith.constant 2 : index
    %c0_17 = arith.constant 0 : index
    %c0_18 = arith.constant 0 : index
    %19 = vector.load %arg3[%c2, %c0_17, %c0_18] : memref<3x128x128xbf16, #tpu.memory_space<vmem>>, vector<1x128x128xbf16>
    %20 = vector.shape_cast %19 : vector<1x128x128xbf16> to vector<128x128xbf16>
    %cst_19 = arith.constant dense<0.000000e+00> : vector<8x128xf32>
    %21 = tpu.matmul %2, %20, %cst_19 {dimension_numbers = #tpu.dot_dimension_numbers<[1], [0], [0], [1], [0, 0, 1, 1], [], []>} : vector<8x128xbf16>, vector<128x128xbf16>, vector<8x128xf32> -> vector<8x128xf32>
    %c2_20 = arith.constant 2 : index
    %c0_21 = arith.constant 0 : index
    %c0_22 = arith.constant 0 : index
    %22 = vector.load %arg4[%c2_20, %c0_21, %c0_22] : memref<3x1x128xf32, #tpu.memory_space<vmem>>, vector<1x1x128xf32>
    %23 = vector.shape_cast %22 : vector<1x1x128xf32> to vector<1x128xf32>
    %24 = vector.broadcast %23 : vector<1x128xf32> to vector<8x128xf32>
    %25 = arith.addf %21, %24 : vector<8x128xf32>
    %26 = vector.extract_strided_slice %11 {offsets = [0, 0], sizes = [8, 32], strides = [1, 1]} : vector<8x128xf32> to vector<8x32xf32>
    %27 = arith.truncf %26 : vector<8x32xf32> to vector<8x32xbf16>
    %28 = vector.extract_strided_slice %18 {offsets = [0, 0], sizes = [8, 32], strides = [1, 1]} : vector<8x128xf32> to vector<8x32xf32>
    %29 = arith.truncf %28 : vector<8x32xf32> to vector<8x32xbf16>
    %30 = vector.extract_strided_slice %25 {offsets = [0, 0], sizes = [8, 32], strides = [1, 1]} : vector<8x128xf32> to vector<8x32xf32>
    %31 = arith.truncf %30 : vector<8x32xf32> to vector<8x32xbf16>
    %cst_23 = arith.constant dense<0.000000e+00> : vector<8x8xf32>
    %32 = tpu.matmul %27, %29, %cst_23 {dimension_numbers = #tpu.dot_dimension_numbers<[1], [1], [0], [0], [0, 0, 1, 0], [], []>} : vector<8x32xbf16>, vector<8x32xbf16>, vector<8x8xf32> -> vector<8x8xf32>
    %cst_24 = arith.constant 0.176776692 : f32
    %33 = vector.broadcast %cst_24 : f32 to vector<8x8xf32>
    %34 = arith.mulf %32, %33 : vector<8x8xf32>
    %35 = vector.broadcast %4 : vector<1x8xf32> to vector<8x8xf32>
    %36 = arith.addf %34, %35 : vector<8x8xf32>
    %cst_25 = arith.constant dense<0xFF800000> : vector<8xf32>
    %37 = vector.multi_reduction <maximumf>, %36, %cst_25 [1] : vector<8x8xf32> to vector<8xf32>
    %38 = vector.shape_cast %37 : vector<8xf32> to vector<8x1xf32>
    %39 = vector.broadcast %38 : vector<8x1xf32> to vector<8x8xf32>
    %40 = arith.subf %36, %39 : vector<8x8xf32>
    %41 = math.exp %40 : vector<8x8xf32>
    %cst_26 = arith.constant dense<0.000000e+00> : vector<8xf32>
    %42 = vector.multi_reduction <add>, %41, %cst_26 [1] : vector<8x8xf32> to vector<8xf32>
    %43 = vector.shape_cast %42 : vector<8xf32> to vector<8x1xf32>
    %44 = tpu.reciprocal %43 {approx = true} : vector<8x1xf32> -> vector<8x1xf32>
    %45 = vector.broadcast %44 : vector<8x1xf32> to vector<8x8xf32>
    %46 = arith.mulf %41, %45 : vector<8x8xf32>
    %47 = arith.truncf %46 : vector<8x8xf32> to vector<8x8xbf16>
    %cst_27 = arith.constant dense<0.000000e+00> : vector<8x32xf32>
    %48 = tpu.matmul %47, %31, %cst_27 {dimension_numbers = #tpu.dot_dimension_numbers<[1], [0], [0], [1], [0, 0, 1, 1], [], []>} : vector<8x8xbf16>, vector<8x32xbf16>, vector<8x32xf32> -> vector<8x32xf32>
    %49 = vector.extract_strided_slice %11 {offsets = [0, 32], sizes = [8, 32], strides = [1, 1]} : vector<8x128xf32> to vector<8x32xf32>
    %50 = arith.truncf %49 : vector<8x32xf32> to vector<8x32xbf16>
    %51 = vector.extract_strided_slice %18 {offsets = [0, 32], sizes = [8, 32], strides = [1, 1]} : vector<8x128xf32> to vector<8x32xf32>
    %52 = arith.truncf %51 : vector<8x32xf32> to vector<8x32xbf16>
    %53 = vector.extract_strided_slice %25 {offsets = [0, 32], sizes = [8, 32], strides = [1, 1]} : vector<8x128xf32> to vector<8x32xf32>
    %54 = arith.truncf %53 : vector<8x32xf32> to vector<8x32xbf16>
    %cst_28 = arith.constant dense<0.000000e+00> : vector<8x8xf32>
    %55 = tpu.matmul %50, %52, %cst_28 {dimension_numbers = #tpu.dot_dimension_numbers<[1], [1], [0], [0], [0, 0, 1, 0], [], []>} : vector<8x32xbf16>, vector<8x32xbf16>, vector<8x8xf32> -> vector<8x8xf32>
    %cst_29 = arith.constant 0.176776692 : f32
    %56 = vector.broadcast %cst_29 : f32 to vector<8x8xf32>
    %57 = arith.mulf %55, %56 : vector<8x8xf32>
    %58 = vector.broadcast %4 : vector<1x8xf32> to vector<8x8xf32>
    %59 = arith.addf %57, %58 : vector<8x8xf32>
    %cst_30 = arith.constant dense<0xFF800000> : vector<8xf32>
    %60 = vector.multi_reduction <maximumf>, %59, %cst_30 [1] : vector<8x8xf32> to vector<8xf32>
    %61 = vector.shape_cast %60 : vector<8xf32> to vector<8x1xf32>
    %62 = vector.broadcast %61 : vector<8x1xf32> to vector<8x8xf32>
    %63 = arith.subf %59, %62 : vector<8x8xf32>
    %64 = math.exp %63 : vector<8x8xf32>
    %cst_31 = arith.constant dense<0.000000e+00> : vector<8xf32>
    %65 = vector.multi_reduction <add>, %64, %cst_31 [1] : vector<8x8xf32> to vector<8xf32>
    %66 = vector.shape_cast %65 : vector<8xf32> to vector<8x1xf32>
    %67 = tpu.reciprocal %66 {approx = true} : vector<8x1xf32> -> vector<8x1xf32>
    %68 = vector.broadcast %67 : vector<8x1xf32> to vector<8x8xf32>
    %69 = arith.mulf %64, %68 : vector<8x8xf32>
    %70 = arith.truncf %69 : vector<8x8xf32> to vector<8x8xbf16>
    %cst_32 = arith.constant dense<0.000000e+00> : vector<8x32xf32>
    %71 = tpu.matmul %70, %54, %cst_32 {dimension_numbers = #tpu.dot_dimension_numbers<[1], [0], [0], [1], [0, 0, 1, 1], [], []>} : vector<8x8xbf16>, vector<8x32xbf16>, vector<8x32xf32> -> vector<8x32xf32>
    %72 = vector.extract_strided_slice %11 {offsets = [0, 64], sizes = [8, 32], strides = [1, 1]} : vector<8x128xf32> to vector<8x32xf32>
    %73 = arith.truncf %72 : vector<8x32xf32> to vector<8x32xbf16>
    %74 = vector.extract_strided_slice %18 {offsets = [0, 64], sizes = [8, 32], strides = [1, 1]} : vector<8x128xf32> to vector<8x32xf32>
    %75 = arith.truncf %74 : vector<8x32xf32> to vector<8x32xbf16>
    %76 = vector.extract_strided_slice %25 {offsets = [0, 64], sizes = [8, 32], strides = [1, 1]} : vector<8x128xf32> to vector<8x32xf32>
    %77 = arith.truncf %76 : vector<8x32xf32> to vector<8x32xbf16>
    %cst_33 = arith.constant dense<0.000000e+00> : vector<8x8xf32>
    %78 = tpu.matmul %73, %75, %cst_33 {dimension_numbers = #tpu.dot_dimension_numbers<[1], [1], [0], [0], [0, 0, 1, 0], [], []>} : vector<8x32xbf16>, vector<8x32xbf16>, vector<8x8xf32> -> vector<8x8xf32>
    %cst_34 = arith.constant 0.176776692 : f32
    %79 = vector.broadcast %cst_34 : f32 to vector<8x8xf32>
    %80 = arith.mulf %78, %79 : vector<8x8xf32>
    %81 = vector.broadcast %4 : vector<1x8xf32> to vector<8x8xf32>
    %82 = arith.addf %80, %81 : vector<8x8xf32>
    %cst_35 = arith.constant dense<0xFF800000> : vector<8xf32>
    %83 = vector.multi_reduction <maximumf>, %82, %cst_35 [1] : vector<8x8xf32> to vector<8xf32>
    %84 = vector.shape_cast %83 : vector<8xf32> to vector<8x1xf32>
    %85 = vector.broadcast %84 : vector<8x1xf32> to vector<8x8xf32>
    %86 = arith.subf %82, %85 : vector<8x8xf32>
    %87 = math.exp %86 : vector<8x8xf32>
    %cst_36 = arith.constant dense<0.000000e+00> : vector<8xf32>
    %88 = vector.multi_reduction <add>, %87, %cst_36 [1] : vector<8x8xf32> to vector<8xf32>
    %89 = vector.shape_cast %88 : vector<8xf32> to vector<8x1xf32>
    %90 = tpu.reciprocal %89 {approx = true} : vector<8x1xf32> -> vector<8x1xf32>
    %91 = vector.broadcast %90 : vector<8x1xf32> to vector<8x8xf32>
    %92 = arith.mulf %87, %91 : vector<8x8xf32>
    %93 = arith.truncf %92 : vector<8x8xf32> to vector<8x8xbf16>
    %cst_37 = arith.constant dense<0.000000e+00> : vector<8x32xf32>
    %94 = tpu.matmul %93, %77, %cst_37 {dimension_numbers = #tpu.dot_dimension_numbers<[1], [0], [0], [1], [0, 0, 1, 1], [], []>} : vector<8x8xbf16>, vector<8x32xbf16>, vector<8x32xf32> -> vector<8x32xf32>
    %95 = vector.extract_strided_slice %11 {offsets = [0, 96], sizes = [8, 32], strides = [1, 1]} : vector<8x128xf32> to vector<8x32xf32>
    %96 = arith.truncf %95 : vector<8x32xf32> to vector<8x32xbf16>
    %97 = vector.extract_strided_slice %18 {offsets = [0, 96], sizes = [8, 32], strides = [1, 1]} : vector<8x128xf32> to vector<8x32xf32>
    %98 = arith.truncf %97 : vector<8x32xf32> to vector<8x32xbf16>
    %99 = vector.extract_strided_slice %25 {offsets = [0, 96], sizes = [8, 32], strides = [1, 1]} : vector<8x128xf32> to vector<8x32xf32>
    %100 = arith.truncf %99 : vector<8x32xf32> to vector<8x32xbf16>
    %cst_38 = arith.constant dense<0.000000e+00> : vector<8x8xf32>
    %101 = tpu.matmul %96, %98, %cst_38 {dimension_numbers = #tpu.dot_dimension_numbers<[1], [1], [0], [0], [0, 0, 1, 0], [], []>} : vector<8x32xbf16>, vector<8x32xbf16>, vector<8x8xf32> -> vector<8x8xf32>
    %cst_39 = arith.constant 0.176776692 : f32
    %102 = vector.broadcast %cst_39 : f32 to vector<8x8xf32>
    %103 = arith.mulf %101, %102 : vector<8x8xf32>
    %104 = vector.broadcast %4 : vector<1x8xf32> to vector<8x8xf32>
    %105 = arith.addf %103, %104 : vector<8x8xf32>
    %cst_40 = arith.constant dense<0xFF800000> : vector<8xf32>
    %106 = vector.multi_reduction <maximumf>, %105, %cst_40 [1] : vector<8x8xf32> to vector<8xf32>
    %107 = vector.shape_cast %106 : vector<8xf32> to vector<8x1xf32>
    %108 = vector.broadcast %107 : vector<8x1xf32> to vector<8x8xf32>
    %109 = arith.subf %105, %108 : vector<8x8xf32>
    %110 = math.exp %109 : vector<8x8xf32>
    %cst_41 = arith.constant dense<0.000000e+00> : vector<8xf32>
    %111 = vector.multi_reduction <add>, %110, %cst_41 [1] : vector<8x8xf32> to vector<8xf32>
    %112 = vector.shape_cast %111 : vector<8xf32> to vector<8x1xf32>
    %113 = tpu.reciprocal %112 {approx = true} : vector<8x1xf32> -> vector<8x1xf32>
    %114 = vector.broadcast %113 : vector<8x1xf32> to vector<8x8xf32>
    %115 = arith.mulf %110, %114 : vector<8x8xf32>
    %116 = arith.truncf %115 : vector<8x8xf32> to vector<8x8xbf16>
    %cst_42 = arith.constant dense<0.000000e+00> : vector<8x32xf32>
    %117 = tpu.matmul %116, %100, %cst_42 {dimension_numbers = #tpu.dot_dimension_numbers<[1], [0], [0], [1], [0, 0, 1, 1], [], []>} : vector<8x8xbf16>, vector<8x32xbf16>, vector<8x32xf32> -> vector<8x32xf32>
    %118 = tpu.concatenate %48, %71, %94, %117 in 1 : vector<8x32xf32>, vector<8x32xf32>, vector<8x32xf32>, vector<8x32xf32> -> vector<8x128xf32>
    %119 = arith.truncf %118 : vector<8x128xf32> to vector<8x128xbf16>
    %c0_43 = arith.constant 0 : index
    %c0_44 = arith.constant 0 : index
    %120 = vector.load %arg5[%c0_43, %c0_44] : memref<128x128xbf16, #tpu.memory_space<vmem>>, vector<128x128xbf16>
    %cst_45 = arith.constant dense<0.000000e+00> : vector<8x128xf32>
    %121 = tpu.matmul %119, %120, %cst_45 {dimension_numbers = #tpu.dot_dimension_numbers<[1], [0], [0], [1], [0, 0, 1, 1], [], []>} : vector<8x128xbf16>, vector<128x128xbf16>, vector<8x128xf32> -> vector<8x128xf32>
    %c0_46 = arith.constant 0 : index
    %c0_47 = arith.constant 0 : index
    %122 = vector.load %arg6[%c0_46, %c0_47] : memref<1x128xf32, #tpu.memory_space<vmem>>, vector<1x128xf32>
    %123 = vector.broadcast %122 : vector<1x128xf32> to vector<8x128xf32>
    %124 = arith.addf %121, %123 : vector<8x128xf32>
    %125 = arith.addf %124, %1 : vector<8x128xf32>
    %c0_48 = arith.constant 0 : index
    %c0_49 = arith.constant 0 : index
    %126 = vector.load %arg7[%c0_48, %c0_49] : memref<1x128xf32, #tpu.memory_space<vmem>>, vector<1x128xf32>
    %c0_50 = arith.constant 0 : index
    %c0_51 = arith.constant 0 : index
    %127 = vector.load %arg8[%c0_50, %c0_51] : memref<1x128xf32, #tpu.memory_space<vmem>>, vector<1x128xf32>
    %cst_52 = arith.constant dense<0.000000e+00> : vector<8xf32>
    %128 = vector.multi_reduction <add>, %125, %cst_52 [1] : vector<8x128xf32> to vector<8xf32>
    %129 = vector.shape_cast %128 : vector<8xf32> to vector<8x1xf32>
    %cst_53 = arith.constant 1.280000e+02 : f32
    %130 = vector.broadcast %cst_53 : f32 to vector<8x1xf32>
    %131 = arith.divf %129, %130 : vector<8x1xf32>
    %132 = vector.broadcast %131 : vector<8x1xf32> to vector<8x128xf32>
    %133 = arith.subf %125, %132 : vector<8x128xf32>
    %134 = arith.mulf %133, %133 : vector<8x128xf32>
    %cst_54 = arith.constant dense<0.000000e+00> : vector<8xf32>
    %135 = vector.multi_reduction <add>, %134, %cst_54 [1] : vector<8x128xf32> to vector<8xf32>
    %136 = vector.shape_cast %135 : vector<8xf32> to vector<8x1xf32>
    %cst_55 = arith.constant 1.280000e+02 : f32
    %137 = vector.broadcast %cst_55 : f32 to vector<8x1xf32>
    %138 = arith.divf %136, %137 : vector<8x1xf32>
    %139 = vector.broadcast %131 : vector<8x1xf32> to vector<8x128xf32>
    %140 = arith.subf %125, %139 : vector<8x128xf32>
    %cst_56 = arith.constant 9.99999996E-13 : f32
    %141 = vector.broadcast %cst_56 : f32 to vector<8x1xf32>
    %142 = arith.addf %138, %141 : vector<8x1xf32>
    %143 = math.rsqrt %142 : vector<8x1xf32>
    %144 = vector.broadcast %143 : vector<8x1xf32> to vector<8x128xf32>
    %145 = arith.mulf %140, %144 : vector<8x128xf32>
    %146 = vector.broadcast %126 : vector<1x128xf32> to vector<8x128xf32>
    %147 = arith.mulf %145, %146 : vector<8x128xf32>
    %148 = vector.broadcast %127 : vector<1x128xf32> to vector<8x128xf32>
    %149 = arith.addf %147, %148 : vector<8x128xf32>
    %150 = arith.truncf %149 : vector<8x128xf32> to vector<8x128xbf16>
    %c0_57 = arith.constant 0 : index
    %c0_58 = arith.constant 0 : index
    %151 = vector.load %arg9[%c0_57, %c0_58] : memref<128x256xbf16, #tpu.memory_space<vmem>>, vector<128x256xbf16>
    %cst_59 = arith.constant dense<0.000000e+00> : vector<8x256xf32>
    %152 = tpu.matmul %150, %151, %cst_59 {dimension_numbers = #tpu.dot_dimension_numbers<[1], [0], [0], [1], [0, 0, 1, 1], [], []>} : vector<8x128xbf16>, vector<128x256xbf16>, vector<8x256xf32> -> vector<8x256xf32>
    %c0_60 = arith.constant 0 : index
    %c0_61 = arith.constant 0 : index
    %153 = vector.load %arg10[%c0_60, %c0_61] : memref<1x256xf32, #tpu.memory_space<vmem>>, vector<1x256xf32>
    %154 = vector.broadcast %153 : vector<1x256xf32> to vector<8x256xf32>
    %155 = arith.addf %152, %154 : vector<8x256xf32>
    %cst_62 = arith.constant 5.000000e-01 : f32
    %156 = vector.broadcast %cst_62 : f32 to vector<8x256xf32>
    %157 = arith.mulf %156, %155 : vector<8x256xf32>
    %cst_63 = arith.constant 4.471500e-02 : f32
    %158 = vector.broadcast %cst_63 : f32 to vector<8x256xf32>
    %159 = arith.mulf %158, %155 : vector<8x256xf32>
    %160 = arith.mulf %159, %155 : vector<8x256xf32>
    %161 = arith.mulf %160, %155 : vector<8x256xf32>
    %162 = arith.addf %155, %161 : vector<8x256xf32>
    %cst_64 = arith.constant 0.797884583 : f32
    %163 = vector.broadcast %cst_64 : f32 to vector<8x256xf32>
    %164 = arith.mulf %163, %162 : vector<8x256xf32>
    %165 = math.tanh %164 : vector<8x256xf32>
    %cst_65 = arith.constant 1.000000e+00 : f32
    %166 = vector.broadcast %cst_65 : f32 to vector<8x256xf32>
    %167 = arith.addf %166, %165 : vector<8x256xf32>
    %168 = arith.mulf %157, %167 : vector<8x256xf32>
    %169 = arith.truncf %168 : vector<8x256xf32> to vector<8x256xbf16>
    %c0_66 = arith.constant 0 : index
    %c0_67 = arith.constant 0 : index
    %170 = vector.load %arg11[%c0_66, %c0_67] : memref<256x128xbf16, #tpu.memory_space<vmem>>, vector<256x128xbf16>
    %cst_68 = arith.constant dense<0.000000e+00> : vector<8x128xf32>
    %171 = tpu.matmul %169, %170, %cst_68 {dimension_numbers = #tpu.dot_dimension_numbers<[1], [0], [0], [1], [0, 0, 1, 1], [], []>} : vector<8x256xbf16>, vector<256x128xbf16>, vector<8x128xf32> -> vector<8x128xf32>
    %c0_69 = arith.constant 0 : index
    %c0_70 = arith.constant 0 : index
    %172 = vector.load %arg12[%c0_69, %c0_70] : memref<1x128xf32, #tpu.memory_space<vmem>>, vector<1x128xf32>
    %173 = vector.broadcast %172 : vector<1x128xf32> to vector<8x128xf32>
    %174 = arith.addf %171, %173 : vector<8x128xf32>
    %175 = arith.addf %174, %149 : vector<8x128xf32>
    %c0_71 = arith.constant 0 : index
    %c0_72 = arith.constant 0 : index
    %176 = vector.load %arg13[%c0_71, %c0_72] : memref<1x128xf32, #tpu.memory_space<vmem>>, vector<1x128xf32>
    %c0_73 = arith.constant 0 : index
    %c0_74 = arith.constant 0 : index
    %177 = vector.load %arg14[%c0_73, %c0_74] : memref<1x128xf32, #tpu.memory_space<vmem>>, vector<1x128xf32>
    %cst_75 = arith.constant dense<0.000000e+00> : vector<8xf32>
    %178 = vector.multi_reduction <add>, %175, %cst_75 [1] : vector<8x128xf32> to vector<8xf32>
    %179 = vector.shape_cast %178 : vector<8xf32> to vector<8x1xf32>
    %cst_76 = arith.constant 1.280000e+02 : f32
    %180 = vector.broadcast %cst_76 : f32 to vector<8x1xf32>
    %181 = arith.divf %179, %180 : vector<8x1xf32>
    %182 = vector.broadcast %181 : vector<8x1xf32> to vector<8x128xf32>
    %183 = arith.subf %175, %182 : vector<8x128xf32>
    %184 = arith.mulf %183, %183 : vector<8x128xf32>
    %cst_77 = arith.constant dense<0.000000e+00> : vector<8xf32>
    %185 = vector.multi_reduction <add>, %184, %cst_77 [1] : vector<8x128xf32> to vector<8xf32>
    %186 = vector.shape_cast %185 : vector<8xf32> to vector<8x1xf32>
    %cst_78 = arith.constant 1.280000e+02 : f32
    %187 = vector.broadcast %cst_78 : f32 to vector<8x1xf32>
    %188 = arith.divf %186, %187 : vector<8x1xf32>
    %189 = vector.broadcast %181 : vector<8x1xf32> to vector<8x128xf32>
    %190 = arith.subf %175, %189 : vector<8x128xf32>
    %cst_79 = arith.constant 9.99999996E-13 : f32
    %191 = vector.broadcast %cst_79 : f32 to vector<8x1xf32>
    %192 = arith.addf %188, %191 : vector<8x1xf32>
    %193 = math.rsqrt %192 : vector<8x1xf32>
    %194 = vector.broadcast %193 : vector<8x1xf32> to vector<8x128xf32>
    %195 = arith.mulf %190, %194 : vector<8x128xf32>
    %196 = vector.broadcast %176 : vector<1x128xf32> to vector<8x128xf32>
    %197 = arith.mulf %195, %196 : vector<8x128xf32>
    %198 = vector.broadcast %177 : vector<1x128xf32> to vector<8x128xf32>
    %199 = arith.addf %197, %198 : vector<8x128xf32>
    %c0_80 = arith.constant 0 : index
    %c0_81 = arith.constant 0 : index
    %c0_82 = arith.constant 0 : index
    %200 = vector.load %arg15[%c0_80, %c0_81, %c0_82] : memref<1x8x128xf32, #tpu.memory_space<vmem>>, vector<1x8x128xf32>
    %201 = vector.shape_cast %200 : vector<1x8x128xf32> to vector<8x128xf32>
    %202 = vector.shape_cast %199 : vector<8x128xf32> to vector<1x8x128xf32>
    tpu.vector_store %arg15[%c0_80, %c0_81, %c0_82], %202 {strides = array<i32>} : memref<1x8x128xf32, #tpu.memory_space<vmem>>, vector<1x8x128xf32>,
    return
  }
  func.func @transform_0(%arg0: i32) -> (i32, i32, i32) {
    %c0_i32 = arith.constant 0 : i32
    %c0_i32_0 = arith.constant 0 : i32
    %c0_i32_1 = arith.constant 0 : i32
    return %arg0, %c0_i32, %c0_i32_0 : i32, i32, i32
  }
  func.func @transform_1(%arg0: i32) -> (i32, i32, i32) {
    %c0_i32 = arith.constant 0 : i32
    %c0_i32_0 = arith.constant 0 : i32
    %c0_i32_1 = arith.constant 0 : i32
    return %arg0, %c0_i32, %c0_i32_0 : i32, i32, i32
  }
  func.func @transform_2(%arg0: i32) -> (i32, i32, i32) {
    %c0_i32 = arith.constant 0 : i32
    %c0_i32_0 = arith.constant 0 : i32
    %c0_i32_1 = arith.constant 0 : i32
    %c0_i32_2 = arith.constant 0 : i32
    return %c0_i32, %c0_i32_0, %c0_i32_1 : i32, i32, i32
  }
  func.func @transform_3(%arg0: i32) -> (i32, i32, i32) {
    %c0_i32 = arith.constant 0 : i32
    %c0_i32_0 = arith.constant 0 : i32
    %c0_i32_1 = arith.constant 0 : i32
    %c0_i32_2 = arith.constant 0 : i32
    return %c0_i32, %c0_i32_0, %c0_i32_1 : i32, i32, i32
  }
  func.func @transform_4(%arg0: i32) -> (i32, i32) {
    %c0_i32 = arith.constant 0 : i32
    %c0_i32_0 = arith.constant 0 : i32
    %c0_i32_1 = arith.constant 0 : i32
    return %c0_i32, %c0_i32_0 : i32, i32
  }
  func.func @transform_5(%arg0: i32) -> (i32, i32) {
    %c0_i32 = arith.constant 0 : i32
    %c0_i32_0 = arith.constant 0 : i32
    %c0_i32_1 = arith.constant 0 : i32
    return %c0_i32, %c0_i32_0 : i32, i32
  }
  func.func @transform_6(%arg0: i32) -> (i32, i32) {
    %c0_i32 = arith.constant 0 : i32
    %c0_i32_0 = arith.constant 0 : i32
    %c0_i32_1 = arith.constant 0 : i32
    return %c0_i32, %c0_i32_0 : i32, i32
  }
  func.func @transform_7(%arg0: i32) -> (i32, i32) {
    %c0_i32 = arith.constant 0 : i32
    %c0_i32_0 = arith.constant 0 : i32
    %c0_i32_1 = arith.constant 0 : i32
    return %c0_i32, %c0_i32_0 : i32, i32
  }
  func.func @transform_8(%arg0: i32) -> (i32, i32) {
    %c0_i32 = arith.constant 0 : i32
    %c0_i32_0 = arith.constant 0 : i32
    %c0_i32_1 = arith.constant 0 : i32
    return %c0_i32, %c0_i32_0 : i32, i32
  }
  func.func @transform_9(%arg0: i32) -> (i32, i32) {
    %c0_i32 = arith.constant 0 : i32
    %c0_i32_0 = arith.constant 0 : i32
    %c0_i32_1 = arith.constant 0 : i32
    return %c0_i32, %c0_i32_0 : i32, i32
  }
  func.func @transform_10(%arg0: i32) -> (i32, i32) {
    %c0_i32 = arith.constant 0 : i32
    %c0_i32_0 = arith.constant 0 : i32
    %c0_i32_1 = arith.constant 0 : i32
    return %c0_i32, %c0_i32_0 : i32, i32
  }
  func.func @transform_11(%arg0: i32) -> (i32, i32) {
    %c0_i32 = arith.constant 0 : i32
    %c0_i32_0 = arith.constant 0 : i32
    %c0_i32_1 = arith.constant 0 : i32
    return %c0_i32, %c0_i32_0 : i32, i32
  }
  func.func @transform_12(%arg0: i32) -> (i32, i32) {
    %c0_i32 = arith.constant 0 : i32
    %c0_i32_0 = arith.constant 0 : i32
    %c0_i32_1 = arith.constant 0 : i32
    return %c0_i32, %c0_i32_0 : i32, i32
  }
  func.func @transform_13(%arg0: i32) -> (i32, i32) {
    %c0_i32 = arith.constant 0 : i32
    %c0_i32_0 = arith.constant 0 : i32
    %c0_i32_1 = arith.constant 0 : i32
    return %c0_i32, %c0_i32_0 : i32, i32
  }
  func.func @transform_14(%arg0: i32) -> (i32, i32, i32) {
    %c0_i32 = arith.constant 0 : i32
    %c0_i32_0 = arith.constant 0 : i32
    %c0_i32_1 = arith.constant 0 : i32
    return %arg0, %c0_i32, %c0_i32_0 : i32, i32, i32
  }
}

module attributes {stable_mosaic.version = 11 : i64} {
  func.func @_encoder_layer_kernel(%arg0: i32, %arg1: memref<1x8x128xf32, #tpu.memory_space<vmem>>, %arg2: memref<1x1x8xf32, #tpu.memory_space<vmem>>, %arg3: memref<3x128x128xbf16, #tpu.memory_space<vmem>>, %arg4: memref<3x1x128xf32, #tpu.memory_space<vmem>>, %arg5: memref<128x128xbf16, #tpu.memory_space<vmem>>, %arg6: memref<1x128xf32, #tpu.memory_space<vmem>>, %arg7: memref<1x128xf32, #tpu.memory_space<vmem>>, %arg8: memref<1x128xf32, #tpu.memory_space<vmem>>, %arg9: memref<128x256xbf16, #tpu.memory_space<vmem>>, %arg10: memref<1x256xf32, #tpu.memory_space<vmem>>, %arg11: memref<256x128xbf16, #tpu.memory_space<vmem>>, %arg12: memref<1x128xf32, #tpu.memory_space<vmem>>, %arg13: memref<1x128xf32, #tpu.memory_space<vmem>>, %arg14: memref<1x128xf32, #tpu.memory_space<vmem>>, %arg15: memref<1x8x128xf32, #tpu.memory_space<vmem>>) attributes {dimension_semantics = [#tpu.dimension_semantics<parallel>], iteration_bounds = array<i64: 2>, scalar_prefetch = 0 : i64, scratch_operands = 0 : i64, tpu.core_type = #tpu.core_type<tc>, window_params = [{transform_indices = @transform_0, window_bounds = array<i64: 1, 8, 128>}, {transform_indices = @transform_1, window_bounds = array<i64: 1, 1, 8>}, {pipeline_mode = #tpu.pipeline_mode<synchronous>, transform_indices = @transform_2, window_bounds = array<i64: 3, 128, 128>}, {pipeline_mode = #tpu.pipeline_mode<synchronous>, transform_indices = @transform_3, window_bounds = array<i64: 3, 1, 128>}, {pipeline_mode = #tpu.pipeline_mode<synchronous>, transform_indices = @transform_4, window_bounds = array<i64: 128, 128>}, {pipeline_mode = #tpu.pipeline_mode<synchronous>, transform_indices = @transform_5, window_bounds = array<i64: 1, 128>}, {pipeline_mode = #tpu.pipeline_mode<synchronous>, transform_indices = @transform_6, window_bounds = array<i64: 1, 128>}, {pipeline_mode = #tpu.pipeline_mode<synchronous>, transform_indices = @transform_7, window_bounds = array<i64: 1, 128>}, {pipeline_mode = #tpu.pipeline_mode<synchronous>, transform_indices = @transform_8, window_bounds = array<i64: 128, 256>}, {pipeline_mode = #tpu.pipeline_mode<synchronous>, transform_indices = @transform_9, window_bounds = array<i64: 1, 256>}, {pipeline_mode = #tpu.pipeline_mode<synchronous>, transform_indices = @transform_10, window_bounds = array<i64: 256, 128>}, {pipeline_mode = #tpu.pipeline_mode<synchronous>, transform_indices = @transform_11, window_bounds = array<i64: 1, 128>}, {pipeline_mode = #tpu.pipeline_mode<synchronous>, transform_indices = @transform_12, window_bounds = array<i64: 1, 128>}, {pipeline_mode = #tpu.pipeline_mode<synchronous>, transform_indices = @transform_13, window_bounds = array<i64: 1, 128>}, {transform_indices = @transform_14, window_bounds = array<i64: 1, 8, 128>}]} {
    %c0 = arith.constant 0 : index
    %c0_0 = arith.constant 0 : index
    %c0_1 = arith.constant 0 : index
    %0 = vector.load %arg1[%c0, %c0_0, %c0_1] : memref<1x8x128xf32, #tpu.memory_space<vmem>>, vector<1x8x128xf32>
    %1 = vector.shape_cast %0 : vector<1x8x128xf32> to vector<8x128xf32>
    %2 = arith.truncf %1 : vector<8x128xf32> to vector<8x128xbf16>
    %c0_2 = arith.constant 0 : index
    %c0_3 = arith.constant 0 : index
    %c0_4 = arith.constant 0 : index
    %3 = vector.load %arg2[%c0_2, %c0_3, %c0_4] : memref<1x1x8xf32, #tpu.memory_space<vmem>>, vector<1x1x8xf32>
    %4 = vector.shape_cast %3 : vector<1x1x8xf32> to vector<1x8xf32>
    %c0_5 = arith.constant 0 : index
    %c0_6 = arith.constant 0 : index
    %c0_7 = arith.constant 0 : index
    %5 = vector.load %arg3[%c0_5, %c0_6, %c0_7] : memref<3x128x128xbf16, #tpu.memory_space<vmem>>, vector<1x128x128xbf16>
    %6 = vector.shape_cast %5 : vector<1x128x128xbf16> to vector<128x128xbf16>
    %cst = arith.constant dense<0.000000e+00> : vector<8x128xf32>
    %7 = tpu.matmul %2, %6, %cst {dimension_numbers = #tpu.dot_dimension_numbers<[1], [0], [0], [1], [0, 0, 1, 1], [], []>} : vector<8x128xbf16>, vector<128x128xbf16>, vector<8x128xf32> -> vector<8x128xf32>
    %c0_8 = arith.constant 0 : index
    %c0_9 = arith.constant 0 : index
    %c0_10 = arith.constant 0 : index
    %8 = vector.load %arg4[%c0_8, %c0_9, %c0_10] : memref<3x1x128xf32, #tpu.memory_space<vmem>>, vector<1x1x128xf32>
    %9 = vector.shape_cast %8 : vector<1x1x128xf32> to vector<1x128xf32>
    %10 = vector.broadcast %9 : vector<1x128xf32> to vector<8x128xf32>
    %11 = arith.addf %7, %10 : vector<8x128xf32>
    %c1 = arith.constant 1 : index
    %c0_11 = arith.constant 0 : index
    %c0_12 = arith.constant 0 : index
    %12 = vector.load %arg3[%c1, %c0_11, %c0_12] : memref<3x128x128xbf16, #tpu.memory_space<vmem>>, vector<1x128x128xbf16>
    %13 = vector.shape_cast %12 : vector<1x128x128xbf16> to vector<128x128xbf16>
    %cst_13 = arith.constant dense<0.000000e+00> : vector<8x128xf32>
    %14 = tpu.matmul %2, %13, %cst_13 {dimension_numbers = #tpu.dot_dimension_numbers<[1], [0], [0], [1], [0, 0, 1, 1], [], []>} : vector<8x128xbf16>, vector<128x128xbf16>, vector<8x128xf32> -> vector<8x128xf32>
    %c1_14 = arith.constant 1 : index
    %c0_15 = arith.constant 0 : index
    %c0_16 = arith.constant 0 : index
    %15 = vector.load %arg4[%c1_14, %c0_15, %c0_16] : memref<3x1x128xf32, #tpu.memory_space<vmem>>, vector<1x1x128xf32>
    %16 = vector.shape_cast %15 : vector<1x1x128xf32> to vector<1x128xf32>
    %17 = vector.broadcast %16 : vector<1x128xf32> to vector<8x128xf32>
    %18 = arith.addf %14, %17 : vector<8x128xf32>
    %c2 = arith.constant 2 : index
    %c0_17 = arith.constant 0 : index
    %c0_18 = arith.constant 0 : index
    %19 = vector.load %arg3[%c2, %c0_17, %c0_18] : memref<3x128x128xbf16, #tpu.memory_space<vmem>>, vector<1x128x128xbf16>
    %20 = vector.shape_cast %19 : vector<1x128x128xbf16> to vector<128x128xbf16>
    %cst_19 = arith.constant dense<0.000000e+00> : vector<8x128xf32>
    %21 = tpu.matmul %2, %20, %cst_19 {dimension_numbers = #tpu.dot_dimension_numbers<[1], [0], [0], [1], [0, 0, 1, 1], [], []>} : vector<8x128xbf16>, vector<128x128xbf16>, vector<8x128xf32> -> vector<8x128xf32>
    %c2_20 = arith.constant 2 : index
    %c0_21 = arith.constant 0 : index
    %c0_22 = arith.constant 0 : index
    %22 = vector.load %arg4[%c2_20, %c0_21, %c0_22] : memref<3x1x128xf32, #tpu.memory_space<vmem>>, vector<1x1x128xf32>
    %23 = vector.shape_cast %22 : vector<1x1x128xf32> to vector<1x128xf32>
    %24 = vector.broadcast %23 : vector<1x128xf32> to vector<8x128xf32>
    %25 = arith.addf %21, %24 : vector<8x128xf32>
    %26 = vector.extract_strided_slice %11 {offsets = [0, 0], sizes = [8, 32], strides = [1, 1]} : vector<8x128xf32> to vector<8x32xf32>
    %27 = arith.truncf %26 : vector<8x32xf32> to vector<8x32xbf16>
    %28 = vector.extract_strided_slice %18 {offsets = [0, 0], sizes = [8, 32], strides = [1, 1]} : vector<8x128xf32> to vector<8x32xf32>
    %29 = arith.truncf %28 : vector<8x32xf32> to vector<8x32xbf16>
    %30 = vector.extract_strided_slice %25 {offsets = [0, 0], sizes = [8, 32], strides = [1, 1]} : vector<8x128xf32> to vector<8x32xf32>
    %31 = arith.truncf %30 : vector<8x32xf32> to vector<8x32xbf16>
    %cst_23 = arith.constant dense<0.000000e+00> : vector<8x8xf32>
    %32 = tpu.matmul %27, %29, %cst_23 {dimension_numbers = #tpu.dot_dimension_numbers<[1], [1], [0], [0], [0, 0, 1, 0], [], []>} : vector<8x32xbf16>, vector<8x32xbf16>, vector<8x8xf32> -> vector<8x8xf32>
    %cst_24 = arith.constant 0.176776692 : f32
    %33 = vector.broadcast %cst_24 : f32 to vector<8x8xf32>
    %34 = arith.mulf %32, %33 : vector<8x8xf32>
    %35 = vector.broadcast %4 : vector<1x8xf32> to vector<8x8xf32>
    %36 = arith.addf %34, %35 : vector<8x8xf32>
    %cst_25 = arith.constant dense<0xFF800000> : vector<8xf32>
    %37 = vector.multi_reduction <maximumf>, %36, %cst_25 [1] : vector<8x8xf32> to vector<8xf32>
    %38 = vector.shape_cast %37 : vector<8xf32> to vector<8x1xf32>
    %39 = vector.broadcast %38 : vector<8x1xf32> to vector<8x8xf32>
    %40 = arith.subf %36, %39 : vector<8x8xf32>
    %41 = math.exp %40 : vector<8x8xf32>
    %cst_26 = arith.constant dense<0.000000e+00> : vector<8xf32>
    %42 = vector.multi_reduction <add>, %41, %cst_26 [1] : vector<8x8xf32> to vector<8xf32>
    %43 = vector.shape_cast %42 : vector<8xf32> to vector<8x1xf32>
    %44 = tpu.reciprocal %43 {approx = true} : vector<8x1xf32> -> vector<8x1xf32>
    %45 = vector.broadcast %44 : vector<8x1xf32> to vector<8x8xf32>
    %46 = arith.mulf %41, %45 : vector<8x8xf32>
    %47 = arith.truncf %46 : vector<8x8xf32> to vector<8x8xbf16>
    %cst_27 = arith.constant dense<0.000000e+00> : vector<8x32xf32>
    %48 = tpu.matmul %47, %31, %cst_27 {dimension_numbers = #tpu.dot_dimension_numbers<[1], [0], [0], [1], [0, 0, 1, 1], [], []>} : vector<8x8xbf16>, vector<8x32xbf16>, vector<8x32xf32> -> vector<8x32xf32>
    %49 = vector.extract_strided_slice %11 {offsets = [0, 32], sizes = [8, 32], strides = [1, 1]} : vector<8x128xf32> to vector<8x32xf32>
    %50 = arith.truncf %49 : vector<8x32xf32> to vector<8x32xbf16>
    %51 = vector.extract_strided_slice %18 {offsets = [0, 32], sizes = [8, 32], strides = [1, 1]} : vector<8x128xf32> to vector<8x32xf32>
    %52 = arith.truncf %51 : vector<8x32xf32> to vector<8x32xbf16>
    %53 = vector.extract_strided_slice %25 {offsets = [0, 32], sizes = [8, 32], strides = [1, 1]} : vector<8x128xf32> to vector<8x32xf32>
    %54 = arith.truncf %53 : vector<8x32xf32> to vector<8x32xbf16>
    %cst_28 = arith.constant dense<0.000000e+00> : vector<8x8xf32>
    %55 = tpu.matmul %50, %52, %cst_28 {dimension_numbers = #tpu.dot_dimension_numbers<[1], [1], [0], [0], [0, 0, 1, 0], [], []>} : vector<8x32xbf16>, vector<8x32xbf16>, vector<8x8xf32> -> vector<8x8xf32>
    %cst_29 = arith.constant 0.176776692 : f32
    %56 = vector.broadcast %cst_29 : f32 to vector<8x8xf32>
    %57 = arith.mulf %55, %56 : vector<8x8xf32>
    %58 = vector.broadcast %4 : vector<1x8xf32> to vector<8x8xf32>
    %59 = arith.addf %57, %58 : vector<8x8xf32>
    %cst_30 = arith.constant dense<0xFF800000> : vector<8xf32>
    %60 = vector.multi_reduction <maximumf>, %59, %cst_30 [1] : vector<8x8xf32> to vector<8xf32>
    %61 = vector.shape_cast %60 : vector<8xf32> to vector<8x1xf32>
    %62 = vector.broadcast %61 : vector<8x1xf32> to vector<8x8xf32>
    %63 = arith.subf %59, %62 : vector<8x8xf32>
    %64 = math.exp %63 : vector<8x8xf32>
    %cst_31 = arith.constant dense<0.000000e+00> : vector<8xf32>
    %65 = vector.multi_reduction <add>, %64, %cst_31 [1] : vector<8x8xf32> to vector<8xf32>
    %66 = vector.shape_cast %65 : vector<8xf32> to vector<8x1xf32>
    %67 = tpu.reciprocal %66 {approx = true} : vector<8x1xf32> -> vector<8x1xf32>
    %68 = vector.broadcast %67 : vector<8x1xf32> to vector<8x8xf32>
    %69 = arith.mulf %64, %68 : vector<8x8xf32>
    %70 = arith.truncf %69 : vector<8x8xf32> to vector<8x8xbf16>
    %cst_32 = arith.constant dense<0.000000e+00> : vector<8x32xf32>
    %71 = tpu.matmul %70, %54, %cst_32 {dimension_numbers = #tpu.dot_dimension_numbers<[1], [0], [0], [1], [0, 0, 1, 1], [], []>} : vector<8x8xbf16>, vector<8x32xbf16>, vector<8x32xf32> -> vector<8x32xf32>
    %72 = vector.extract_strided_slice %11 {offsets = [0, 64], sizes = [8, 32], strides = [1, 1]} : vector<8x128xf32> to vector<8x32xf32>
    %73 = arith.truncf %72 : vector<8x32xf32> to vector<8x32xbf16>
    %74 = vector.extract_strided_slice %18 {offsets = [0, 64], sizes = [8, 32], strides = [1, 1]} : vector<8x128xf32> to vector<8x32xf32>
    %75 = arith.truncf %74 : vector<8x32xf32> to vector<8x32xbf16>
    %76 = vector.extract_strided_slice %25 {offsets = [0, 64], sizes = [8, 32], strides = [1, 1]} : vector<8x128xf32> to vector<8x32xf32>
    %77 = arith.truncf %76 : vector<8x32xf32> to vector<8x32xbf16>
    %cst_33 = arith.constant dense<0.000000e+00> : vector<8x8xf32>
    %78 = tpu.matmul %73, %75, %cst_33 {dimension_numbers = #tpu.dot_dimension_numbers<[1], [1], [0], [0], [0, 0, 1, 0], [], []>} : vector<8x32xbf16>, vector<8x32xbf16>, vector<8x8xf32> -> vector<8x8xf32>
    %cst_34 = arith.constant 0.176776692 : f32
    %79 = vector.broadcast %cst_34 : f32 to vector<8x8xf32>
    %80 = arith.mulf %78, %79 : vector<8x8xf32>
    %81 = vector.broadcast %4 : vector<1x8xf32> to vector<8x8xf32>
    %82 = arith.addf %80, %81 : vector<8x8xf32>
    %cst_35 = arith.constant dense<0xFF800000> : vector<8xf32>
    %83 = vector.multi_reduction <maximumf>, %82, %cst_35 [1] : vector<8x8xf32> to vector<8xf32>
    %84 = vector.shape_cast %83 : vector<8xf32> to vector<8x1xf32>
    %85 = vector.broadcast %84 : vector<8x1xf32> to vector<8x8xf32>
    %86 = arith.subf %82, %85 : vector<8x8xf32>
    %87 = math.exp %86 : vector<8x8xf32>
    %cst_36 = arith.constant dense<0.000000e+00> : vector<8xf32>
    %88 = vector.multi_reduction <add>, %87, %cst_36 [1] : vector<8x8xf32> to vector<8xf32>
    %89 = vector.shape_cast %88 : vector<8xf32> to vector<8x1xf32>
    %90 = tpu.reciprocal %89 {approx = true} : vector<8x1xf32> -> vector<8x1xf32>
    %91 = vector.broadcast %90 : vector<8x1xf32> to vector<8x8xf32>
    %92 = arith.mulf %87, %91 : vector<8x8xf32>
    %93 = arith.truncf %92 : vector<8x8xf32> to vector<8x8xbf16>
    %cst_37 = arith.constant dense<0.000000e+00> : vector<8x32xf32>
    %94 = tpu.matmul %93, %77, %cst_37 {dimension_numbers = #tpu.dot_dimension_numbers<[1], [0], [0], [1], [0, 0, 1, 1], [], []>} : vector<8x8xbf16>, vector<8x32xbf16>, vector<8x32xf32> -> vector<8x32xf32>
    %95 = vector.extract_strided_slice %11 {offsets = [0, 96], sizes = [8, 32], strides = [1, 1]} : vector<8x128xf32> to vector<8x32xf32>
    %96 = arith.truncf %95 : vector<8x32xf32> to vector<8x32xbf16>
    %97 = vector.extract_strided_slice %18 {offsets = [0, 96], sizes = [8, 32], strides = [1, 1]} : vector<8x128xf32> to vector<8x32xf32>
    %98 = arith.truncf %97 : vector<8x32xf32> to vector<8x32xbf16>
    %99 = vector.extract_strided_slice %25 {offsets = [0, 96], sizes = [8, 32], strides = [1, 1]} : vector<8x128xf32> to vector<8x32xf32>
    %100 = arith.truncf %99 : vector<8x32xf32> to vector<8x32xbf16>
    %cst_38 = arith.constant dense<0.000000e+00> : vector<8x8xf32>
    %101 = tpu.matmul %96, %98, %cst_38 {dimension_numbers = #tpu.dot_dimension_numbers<[1], [1], [0], [0], [0, 0, 1, 0], [], []>} : vector<8x32xbf16>, vector<8x32xbf16>, vector<8x8xf32> -> vector<8x8xf32>
    %cst_39 = arith.constant 0.176776692 : f32
    %102 = vector.broadcast %cst_39 : f32 to vector<8x8xf32>
    %103 = arith.mulf %101, %102 : vector<8x8xf32>
    %104 = vector.broadcast %4 : vector<1x8xf32> to vector<8x8xf32>
    %105 = arith.addf %103, %104 : vector<8x8xf32>
    %cst_40 = arith.constant dense<0xFF800000> : vector<8xf32>
    %106 = vector.multi_reduction <maximumf>, %105, %cst_40 [1] : vector<8x8xf32> to vector<8xf32>
    %107 = vector.shape_cast %106 : vector<8xf32> to vector<8x1xf32>
    %108 = vector.broadcast %107 : vector<8x1xf32> to vector<8x8xf32>
    %109 = arith.subf %105, %108 : vector<8x8xf32>
    %110 = math.exp %109 : vector<8x8xf32>
    %cst_41 = arith.constant dense<0.000000e+00> : vector<8xf32>
    %111 = vector.multi_reduction <add>, %110, %cst_41 [1] : vector<8x8xf32> to vector<8xf32>
    %112 = vector.shape_cast %111 : vector<8xf32> to vector<8x1xf32>
    %113 = tpu.reciprocal %112 {approx = true} : vector<8x1xf32> -> vector<8x1xf32>
    %114 = vector.broadcast %113 : vector<8x1xf32> to vector<8x8xf32>
    %115 = arith.mulf %110, %114 : vector<8x8xf32>
    %116 = arith.truncf %115 : vector<8x8xf32> to vector<8x8xbf16>
    %cst_42 = arith.constant dense<0.000000e+00> : vector<8x32xf32>
    %117 = tpu.matmul %116, %100, %cst_42 {dimension_numbers = #tpu.dot_dimension_numbers<[1], [0], [0], [1], [0, 0, 1, 1], [], []>} : vector<8x8xbf16>, vector<8x32xbf16>, vector<8x32xf32> -> vector<8x32xf32>
    %118 = tpu.concatenate %48, %71, %94, %117 in 1 : vector<8x32xf32>, vector<8x32xf32>, vector<8x32xf32>, vector<8x32xf32> -> vector<8x128xf32>
    %119 = arith.truncf %118 : vector<8x128xf32> to vector<8x128xbf16>
    %c0_43 = arith.constant 0 : index
    %c0_44 = arith.constant 0 : index
    %120 = vector.load %arg5[%c0_43, %c0_44] : memref<128x128xbf16, #tpu.memory_space<vmem>>, vector<128x128xbf16>
    %cst_45 = arith.constant dense<0.000000e+00> : vector<8x128xf32>
    %121 = tpu.matmul %119, %120, %cst_45 {dimension_numbers = #tpu.dot_dimension_numbers<[1], [0], [0], [1], [0, 0, 1, 1], [], []>} : vector<8x128xbf16>, vector<128x128xbf16>, vector<8x128xf32> -> vector<8x128xf32>
    %c0_46 = arith.constant 0 : index
    %c0_47 = arith.constant 0 : index
    %122 = vector.load %arg6[%c0_46, %c0_47] : memref<1x128xf32, #tpu.memory_space<vmem>>, vector<1x128xf32>
    %123 = vector.broadcast %122 : vector<1x128xf32> to vector<8x128xf32>
    %124 = arith.addf %121, %123 : vector<8x128xf32>
    %125 = arith.addf %124, %1 : vector<8x128xf32>
    %c0_48 = arith.constant 0 : index
    %c0_49 = arith.constant 0 : index
    %126 = vector.load %arg7[%c0_48, %c0_49] : memref<1x128xf32, #tpu.memory_space<vmem>>, vector<1x128xf32>
    %c0_50 = arith.constant 0 : index
    %c0_51 = arith.constant 0 : index
    %127 = vector.load %arg8[%c0_50, %c0_51] : memref<1x128xf32, #tpu.memory_space<vmem>>, vector<1x128xf32>
    %cst_52 = arith.constant dense<0.000000e+00> : vector<8xf32>
    %128 = vector.multi_reduction <add>, %125, %cst_52 [1] : vector<8x128xf32> to vector<8xf32>
    %129 = vector.shape_cast %128 : vector<8xf32> to vector<8x1xf32>
    %cst_53 = arith.constant 1.280000e+02 : f32
    %130 = vector.broadcast %cst_53 : f32 to vector<8x1xf32>
    %131 = arith.divf %129, %130 : vector<8x1xf32>
    %132 = vector.broadcast %131 : vector<8x1xf32> to vector<8x128xf32>
    %133 = arith.subf %125, %132 : vector<8x128xf32>
    %134 = arith.mulf %133, %133 : vector<8x128xf32>
    %cst_54 = arith.constant dense<0.000000e+00> : vector<8xf32>
    %135 = vector.multi_reduction <add>, %134, %cst_54 [1] : vector<8x128xf32> to vector<8xf32>
    %136 = vector.shape_cast %135 : vector<8xf32> to vector<8x1xf32>
    %cst_55 = arith.constant 1.280000e+02 : f32
    %137 = vector.broadcast %cst_55 : f32 to vector<8x1xf32>
    %138 = arith.divf %136, %137 : vector<8x1xf32>
    %139 = vector.broadcast %131 : vector<8x1xf32> to vector<8x128xf32>
    %140 = arith.subf %125, %139 : vector<8x128xf32>
    %cst_56 = arith.constant 9.99999996E-13 : f32
    %141 = vector.broadcast %cst_56 : f32 to vector<8x1xf32>
    %142 = arith.addf %138, %141 : vector<8x1xf32>
    %143 = math.rsqrt %142 : vector<8x1xf32>
    %144 = vector.broadcast %143 : vector<8x1xf32> to vector<8x128xf32>
    %145 = arith.mulf %140, %144 : vector<8x128xf32>
    %146 = vector.broadcast %126 : vector<1x128xf32> to vector<8x128xf32>
    %147 = arith.mulf %145, %146 : vector<8x128xf32>
    %148 = vector.broadcast %127 : vector<1x128xf32> to vector<8x128xf32>
    %149 = arith.addf %147, %148 : vector<8x128xf32>
    %150 = arith.truncf %149 : vector<8x128xf32> to vector<8x128xbf16>
    %c0_57 = arith.constant 0 : index
    %c0_58 = arith.constant 0 : index
    %151 = vector.load %arg9[%c0_57, %c0_58] : memref<128x256xbf16, #tpu.memory_space<vmem>>, vector<128x256xbf16>
    %cst_59 = arith.constant dense<0.000000e+00> : vector<8x256xf32>
    %152 = tpu.matmul %150, %151, %cst_59 {dimension_numbers = #tpu.dot_dimension_numbers<[1], [0], [0], [1], [0, 0, 1, 1], [], []>} : vector<8x128xbf16>, vector<128x256xbf16>, vector<8x256xf32> -> vector<8x256xf32>
    %c0_60 = arith.constant 0 : index
    %c0_61 = arith.constant 0 : index
    %153 = vector.load %arg10[%c0_60, %c0_61] : memref<1x256xf32, #tpu.memory_space<vmem>>, vector<1x256xf32>
    %154 = vector.broadcast %153 : vector<1x256xf32> to vector<8x256xf32>
    %155 = arith.addf %152, %154 : vector<8x256xf32>
    %cst_62 = arith.constant 5.000000e-01 : f32
    %156 = vector.broadcast %cst_62 : f32 to vector<8x256xf32>
    %157 = arith.mulf %156, %155 : vector<8x256xf32>
    %cst_63 = arith.constant 4.471500e-02 : f32
    %158 = vector.broadcast %cst_63 : f32 to vector<8x256xf32>
    %159 = arith.mulf %158, %155 : vector<8x256xf32>
    %160 = arith.mulf %159, %155 : vector<8x256xf32>
    %161 = arith.mulf %160, %155 : vector<8x256xf32>
    %162 = arith.addf %155, %161 : vector<8x256xf32>
    %cst_64 = arith.constant 0.797884583 : f32
    %163 = vector.broadcast %cst_64 : f32 to vector<8x256xf32>
    %164 = arith.mulf %163, %162 : vector<8x256xf32>
    %165 = math.tanh %164 : vector<8x256xf32>
    %cst_65 = arith.constant 1.000000e+00 : f32
    %166 = vector.broadcast %cst_65 : f32 to vector<8x256xf32>
    %167 = arith.addf %166, %165 : vector<8x256xf32>
    %168 = arith.mulf %157, %167 : vector<8x256xf32>
    %169 = arith.truncf %168 : vector<8x256xf32> to vector<8x256xbf16>
    %c0_66 = arith.constant 0 : index
    %c0_67 = arith.constant 0 : index
    %170 = vector.load %arg11[%c0_66, %c0_67] : memref<256x128xbf16, #tpu.memory_space<vmem>>, vector<256x128xbf16>
    %cst_68 = arith.constant dense<0.000000e+00> : vector<8x128xf32>
    %171 = tpu.matmul %169, %170, %cst_68 {dimension_numbers = #tpu.dot_dimension_numbers<[1], [0], [0], [1], [0, 0, 1, 1], [], []>} : vector<8x256xbf16>, vector<256x128xbf16>, vector<8x128xf32> -> vector<8x128xf32>
    %c0_69 = arith.constant 0 : index
    %c0_70 = arith.constant 0 : index
    %172 = vector.load %arg12[%c0_69, %c0_70] : memref<1x128xf32, #tpu.memory_space<vmem>>, vector<1x128xf32>
    %173 = vector.broadcast %172 : vector<1x128xf32> to vector<8x128xf32>
    %174 = arith.addf %171, %173 : vector<8x128xf32>
    %175 = arith.addf %174, %149 : vector<8x128xf32>
    %c0_71 = arith.constant 0 : index
    %c0_72 = arith.constant 0 : index
    %176 = vector.load %arg13[%c0_71, %c0_72] : memref<1x128xf32, #tpu.memory_space<vmem>>, vector<1x128xf32>
    %c0_73 = arith.constant 0 : index
    %c0_74 = arith.constant 0 : index
    %177 = vector.load %arg14[%c0_73, %c0_74] : memref<1x128xf32, #tpu.memory_space<vmem>>, vector<1x128xf32>
    %cst_75 = arith.constant dense<0.000000e+00> : vector<8xf32>
    %178 = vector.multi_reduction <add>, %175, %cst_75 [1] : vector<8x128xf32> to vector<8xf32>
    %179 = vector.shape_cast %178 : vector<8xf32> to vector<8x1xf32>
    %cst_76 = arith.constant 1.280000e+02 : f32
    %180 = vector.broadcast %cst_76 : f32 to vector<8x1xf32>
    %181 = arith.divf %179, %180 : vector<8x1xf32>
    %182 = vector.broadcast %181 : vector<8x1xf32> to vector<8x128xf32>
    %183 = arith.subf %175, %182 : vector<8x128xf32>
    %184 = arith.mulf %183, %183 : vector<8x128xf32>
    %cst_77 = arith.constant dense<0.000000e+00> : vector<8xf32>
    %185 = vector.multi_reduction <add>, %184, %cst_77 [1] : vector<8x128xf32> to vector<8xf32>
    %186 = vector.shape_cast %185 : vector<8xf32> to vector<8x1xf32>
    %cst_78 = arith.constant 1.280000e+02 : f32
    %187 = vector.broadcast %cst_78 : f32 to vector<8x1xf32>
    %188 = arith.divf %186, %187 : vector<8x1xf32>
    %189 = vector.broadcast %181 : vector<8x1xf32> to vector<8x128xf32>
    %190 = arith.subf %175, %189 : vector<8x128xf32>
    %cst_79 = arith.constant 9.99999996E-13 : f32
    %191 = vector.broadcast %cst_79 : f32 to vector<8x1xf32>
    %192 = arith.addf %188, %191 : vector<8x1xf32>
    %193 = math.rsqrt %192 : vector<8x1xf32>
    %194 = vector.broadcast %193 : vector<8x1xf32> to vector<8x128xf32>
    %195 = arith.mulf %190, %194 : vector<8x128xf32>
    %196 = vector.broadcast %176 : vector<1x128xf32> to vector<8x128xf32>
    %197 = arith.mulf %195, %196 : vector<8x128xf32>
    %198 = vector.broadcast %177 : vector<1x128xf32> to vector<8x128xf32>
    %199 = arith.addf %197, %198 : vector<8x128xf32>
    %c0_80 = arith.constant 0 : index
    %c0_81 = arith.constant 0 : index
    %c0_82 = arith.constant 0 : index
    %200 = vector.load %arg15[%c0_80, %c0_81, %c0_82] : memref<1x8x128xf32, #tpu.memory_space<vmem>>, vector<1x8x128xf32>
    %201 = vector.shape_cast %200 : vector<1x8x128xf32> to vector<8x128xf32>
    %202 = vector.shape_cast %199 : vector<8x128xf32> to vector<1x8x128xf32>
    tpu.vector_store %arg15[%c0_80, %c0_81, %c0_82], %202 {strides = array<i32>} : memref<1x8x128xf32, #tpu.memory_space<vmem>>, vector<1x8x128xf32>,
    return
  }
  func.func @transform_0(%arg0: i32) -> (i32, i32, i32) {
    %c0_i32 = arith.constant 0 : i32
    %c0_i32_0 = arith.constant 0 : i32
    %c0_i32_1 = arith.constant 0 : i32
    return %arg0, %c0_i32, %c0_i32_0 : i32, i32, i32
  }
  func.func @transform_1(%arg0: i32) -> (i32, i32, i32) {
    %c0_i32 = arith.constant 0 : i32
    %c0_i32_0 = arith.constant 0 : i32
    %c0_i32_1 = arith.constant 0 : i32
    return %arg0, %c0_i32, %c0_i32_0 : i32, i32, i32
  }
  func.func @transform_2(%arg0: i32) -> (i32, i32, i32) {
    %c0_i32 = arith.constant 0 : i32
    %c0_i32_0 = arith.constant 0 : i32
    %c0_i32_1 = arith.constant 0 : i32
    %c0_i32_2 = arith.constant 0 : i32
    return %c0_i32, %c0_i32_0, %c0_i32_1 : i32, i32, i32
  }
  func.func @transform_3(%arg0: i32) -> (i32, i32, i32) {
    %c0_i32 = arith.constant 0 : i32
    %c0_i32_0 = arith.constant 0 : i32
    %c0_i32_1 = arith.constant 0 : i32
    %c0_i32_2 = arith.constant 0 : i32
    return %c0_i32, %c0_i32_0, %c0_i32_1 : i32, i32, i32
  }
  func.func @transform_4(%arg0: i32) -> (i32, i32) {
    %c0_i32 = arith.constant 0 : i32
    %c0_i32_0 = arith.constant 0 : i32
    %c0_i32_1 = arith.constant 0 : i32
    return %c0_i32, %c0_i32_0 : i32, i32
  }
  func.func @transform_5(%arg0: i32) -> (i32, i32) {
    %c0_i32 = arith.constant 0 : i32
    %c0_i32_0 = arith.constant 0 : i32
    %c0_i32_1 = arith.constant 0 : i32
    return %c0_i32, %c0_i32_0 : i32, i32
  }
  func.func @transform_6(%arg0: i32) -> (i32, i32) {
    %c0_i32 = arith.constant 0 : i32
    %c0_i32_0 = arith.constant 0 : i32
    %c0_i32_1 = arith.constant 0 : i32
    return %c0_i32, %c0_i32_0 : i32, i32
  }
  func.func @transform_7(%arg0: i32) -> (i32, i32) {
    %c0_i32 = arith.constant 0 : i32
    %c0_i32_0 = arith.constant 0 : i32
    %c0_i32_1 = arith.constant 0 : i32
    return %c0_i32, %c0_i32_0 : i32, i32
  }
  func.func @transform_8(%arg0: i32) -> (i32, i32) {
    %c0_i32 = arith.constant 0 : i32
    %c0_i32_0 = arith.constant 0 : i32
    %c0_i32_1 = arith.constant 0 : i32
    return %c0_i32, %c0_i32_0 : i32, i32
  }
  func.func @transform_9(%arg0: i32) -> (i32, i32) {
    %c0_i32 = arith.constant 0 : i32
    %c0_i32_0 = arith.constant 0 : i32
    %c0_i32_1 = arith.constant 0 : i32
    return %c0_i32, %c0_i32_0 : i32, i32
  }
  func.func @transform_10(%arg0: i32) -> (i32, i32) {
    %c0_i32 = arith.constant 0 : i32
    %c0_i32_0 = arith.constant 0 : i32
    %c0_i32_1 = arith.constant 0 : i32
    return %c0_i32, %c0_i32_0 : i32, i32
  }
  func.func @transform_11(%arg0: i32) -> (i32, i32) {
    %c0_i32 = arith.constant 0 : i32
    %c0_i32_0 = arith.constant 0 : i32
    %c0_i32_1 = arith.constant 0 : i32
    return %c0_i32, %c0_i32_0 : i32, i32
  }
  func.func @transform_12(%arg0: i32) -> (i32, i32) {
    %c0_i32 = arith.constant 0 : i32
    %c0_i32_0 = arith.constant 0 : i32
    %c0_i32_1 = arith.constant 0 : i32
    return %c0_i32, %c0_i32_0 : i32, i32
  }
  func.func @transform_13(%arg0: i32) -> (i32, i32) {
    %c0_i32 = arith.constant 0 : i32
    %c0_i32_0 = arith.constant 0 : i32
    %c0_i32_1 = arith.constant 0 : i32
    return %c0_i32, %c0_i32_0 : i32, i32
  }
  func.func @transform_14(%arg0: i32) -> (i32, i32, i32) {
    %c0_i32 = arith.constant 0 : i32
    %c0_i32_0 = arith.constant 0 : i32
    %c0_i32_1 = arith.constant 0 : i32
    return %arg0, %c0_i32, %c0_i32_0 : i32, i32, i32
  }
}

</mosaic_0001>

<bundles_post_ra>
// kernel: distilbert_class_forward.3
= control target key start
LH: loop header
LB: loop body
LE: loop exit
PB: predicated region body
PF: predicated region fallthrough
CT: control target
= control target key end

     0   :  { %s298_s12 = smov 0   ;;  %s321_s0 = inlined_call_operand.vmem [shape: f32[16,128], index: 0, kind: input, shape index: {}]   ;;  %s322_s1 = inlined_call_operand.vmem [shape: f32[1,128], index: 1, kind: input, shape index: {}]   ;;  %s323_s2 = inlined_call_operand.vmem [shape: f32[1,128], index: 2, kind: input, shape index: {}]   ;;  %s324_s3 = inlined_call_operand.vmem [shape: f32[16,128], index: 3, kind: output, shape index: {}]  }
   0x1 LB: > { %s249_s13 = sadd.s32 4294967295, %s276_s12   ;;  %p253_p0 = scmp.ge.s32.totalorder %s276_s12, 1  ;;  %s276_s12 = sphi %s298_s12, %s13_s12  }
   0x2   : > { %p136_p1 = scmp.lt.s32.totalorder %s276_s12, 3 }
   0x4   : > { %p137_p2 = pnand %p253_p0, %p136_p1 }
   0x5   : > { %p158_p3 = scmp.lt.s32.totalorder (!%p137_p2), %s249_s13, 1 }
   0x6   : > { %140 = sbr.rel (%p137_p2) target bundleno = 322 (0x142), region = 32 }
   0xb   : > { %s326_s13 = smov (!%p158_p3, %s249_s13), 1  ;;  %v256_v9 = vld [vmem:[%s322_s1] ss:$0 sm:$0xff] }
   0xc   : > { %s254_s14 = sshll.u32 %s326_s13, 3  ;;  %v257_v11 = vld [vmem:[%s323_s2] ss:$0 sm:$0xff] }
   0xd   : > { %s161_s17 = scalar_lea.vmem %s321_s0, %s254_s14  ;;  %s165_s24 = scalar_lea.vmem %s324_s3, %s254_s14 }
   0xe   : > { %v166_v0 = vld [vmem:[%s161_s17] sm:$0xff] }
   0xf   : > { %169 = vadd.xlane.f32.xlu0 %v166_v0 }
  0x98   : > { %v170_v1 = vpop.xlane.xlu0 %169 }
  0x99   : > { %v172_v2 = vmul.f32 0.0078125, %v170_v1 }
  0x9b   : > { %v173_v3 = vsub.f32 %v166_v0, %v172_v2 }
  0x9d   : > { %v174_v4 = vmul.f32 %v173_v3, %v173_v3 }
  0x9f   : > { %175 = vadd.xlane.f32.xlu0 %v174_v4 }
 0x128   : > { %v176_v5 = vpop.xlane.xlu0 %175 }
 0x129   : > { %v177_v6 = vmul.f32 0.0078125, %v176_v5 }
 0x12b   : > { %v178_v7 = vadd.f32 1e-12, %v177_v6 }
 0x12d   : > { %268 = vrsqrt.f32 %v178_v7 }
 0x13a   : > { %v269_v8 = vpop.eup %268 }
 0x13b   : > { %v180_v10 = vmul.f32 %v269_v8, %v173_v3 }
 0x13d   : > { %v187_v12 = vmul.f32 %v256_v9, %v180_v10 }
 0x13f   : > { %v194_v13 = vadd.f32 %v257_v11, %v187_v12 }
 0x141   : > { %195 = vst [vmem:[%s165_s24] sm:$0xff] %v194_v13 }
 0x142 PF: > { %s13_s12 = sadd.s32 1, %s276_s12  }
 0x143   : > { %p10_p4 = scmp.ge.s32.totalorder %s13_s12, 4  }
 0x145   :  { %12 = sbr.rel (!%p10_p4) target bundleno = 1 (0x1), region = 62 }

// kernel: distilbert_class_forward.5
= control target key start
LH: loop header
LB: loop body
LE: loop exit
PB: predicated region body
PF: predicated region fallthrough
CT: control target
= control target key end

     0   :  { %s2395_s29 = smov 0   ;;  %s2783_s0 = inlined_call_operand.vmem [shape: f32[2,8,128], index: 0, kind: input, shape index: {}]   ;;  %s2784_s1 = inlined_call_operand.vmem [shape: f32[2,1,8], index: 1, kind: input, shape index: {}]   ;;  %s2785_s2 = inlined_call_operand.vmem [shape: bf16[3,128,128], index: 2, kind: input, shape index: {}]   ;;  %s2786_s3 = inlined_call_operand.vmem [shape: f32[3,1,128], index: 3, kind: input, shape index: {}]   ;;  %s2787_s4 = inlined_call_operand.vmem [shape: bf16[128,128], index: 4, kind: input, shape index: {}]   ;;  %s2788_s5 = inlined_call_operand.vmem [shape: f32[1,128], index: 5, kind: input, shape index: {}]   ;;  %s2789_s6 = inlined_call_operand.vmem [shape: f32[1,128], index: 6, kind: input, shape index: {}]   ;;  %s2790_s7 = inlined_call_operand.vmem [shape: f32[1,128], index: 7, kind: input, shape index: {}]   ;;  %s2791_s8 = inlined_call_operand.vmem [shape: bf16[128,256], index: 8, kind: input, shape index: {}]   ;;  %s2792_s9 = inlined_call_operand.vmem [shape: f32[1,256], index: 9, kind: input, shape index: {}]   ;;  %s2793_s10 = inlined_call_operand.vmem [shape: bf16[256,128], index: 10, kind: input, shape index: {}]   ;;  %s2794_s11 = inlined_call_operand.vmem [shape: f32[1,128], index: 11, kind: input, shape index: {}]   ;;  %s2795_s12 = inlined_call_operand.vmem [shape: f32[1,128], index: 12, kind: input, shape index: {}]   ;;  %s2796_s13 = inlined_call_operand.vmem [shape: f32[1,128], index: 13, kind: input, shape index: {}]   ;;  %s2797_s14 = inlined_call_operand.vmem [shape: f32[2,8,128], index: 14, kind: output, shape index: {}]  }
   0x1 LB: > { %s1869_s30 = sadd.s32 4294967295, %s2312_s29   ;;  %p1873_p0 = scmp.ge.s32.totalorder %s2312_s29, 1  ;;  %s2312_s29 = sphi %s2395_s29, %s24_s29  }
   0x2   : > { %p419_p1 = scmp.lt.s32.totalorder %s2312_s29, 3 }
   0x4   : > { %p420_p2 = pnand %p1873_p0, %p419_p1 }
   0x5   : > { %p466_p3 = scmp.lt.s32.totalorder (!%p420_p2), %s1869_s30, 1  ;;  %s2316_s28 = smov (!%p420_p2), 96  }
   0x6   : > { %423 = sbr.rel (%p420_p2) target bundleno = 3869 (0xf1d), region = 76  ;;  %s2317_s25 = smov (!%p420_p2), 64  }
   0x7   : > { %s2318_s26 = smov (!%p420_p2), 32  }
   0xb   : > { %v2210_v0 = vld [vmem:[%s2785_s2 + $0x78] sm:$0xff]   ;;  %v2314_v1 = vmov 0.0   ;;  %v2212_v3 = vld [vmem:[%s2785_s2 + $0x70] sm:$0xff]   ;;  %vm2315_vm0 = vmmov 0   ;;  %v2214_v5 = vld [vmem:[%s2785_s2 + $0x68] sm:$0xff]   ;;  %s2799_s30 = smov (!%p466_p3, %s1869_s30), 1 }
   0xc   : > { %2088 = vmatprep.subr.bf16.mxu1 %v2314_v1  ;;  %2068 = vmatprep.subr.bf16.mxu0 %v2314_v1  ;;  %v2211_v2 = vld [vmem:[%s2785_s2 + $0x38] sm:$0xff]   ;;  %v2213_v4 = vld [vmem:[%s2785_s2 + $0x30] sm:$0xff]   ;;  %v2215_v6 = vld [vmem:[%s2785_s2 + $0x28] sm:$0xff]   ;;  %s1874_s23 = sshll.u32 %s2799_s30, 3  ;;  %vm821_vm1 = vcmask 261120   ;;  %s472_s21 = scalar_lea.vmem %s2784_s1, %s2799_s30  ;;  %vm876_vm2 = vcmask 64512  }
   0xd   : > { %2089 = vmatpush3.bf16.msra.mxu1 %v2210_v0  ;;  %2104 = vmatprep.mubr.msk.bf16.mxu1 %vm2315_vm0, %v2314_v1  ;;  %v2216_v7 = vld [vmem:[%s2785_s2 + $0x60] sm:$0xff]   ;;  %v2218_v9 = vld [vmem:[%s2785_s2 + $0x58] sm:$0xff]   ;;  %v2220_v11 = vld [vmem:[%s2785_s2 + $0x50] sm:$0xff]   ;;  %s469_s18 = scalar_lea.vmem %s2783_s0, %s1874_s23  ;;  %vm892_vm3 = vcmask 1043456   ;;  %vm1288_vm4 = vcmask 523264   ;;  %vm1290_vm5 = vcmask 785408  }
   0xe   : > { %2069 = vmatpush3.bf16.msra.mxu0 %v2211_v2  ;;  %2090 = vmatprep.subr.bf16.mxu1 %v2314_v1  ;;  %v2217_v8 = vld [vmem:[%s2785_s2 + $0x20] sm:$0xff]   ;;  %v2219_v10 = vld [vmem:[%s2785_s2 + $0x18] sm:$0xff]   ;;  %v2221_v12 = vld [vmem:[%s2785_s2 + $0x10] sm:$0xff]  }
   0xf   : > { %2070 = vmatprep.subr.bf16.mxu0 %v2314_v1  ;;  %2084 = vmatprep.mubr.msk.bf16.mxu0 %vm2315_vm0, %v2314_v1  ;;  %v2222_v13 = vld [vmem:[%s2785_s2 + $0x48] sm:$0xff]   ;;  %v2224_v15 = vld [vmem:[%s2785_s2 + $0x40] sm:$0xff]   ;;  %v2226_v34 = vld [vmem:[%s2785_s2 + $0xb8] sm:$0xff]  }
  0x10   : > { %v2223_v14 = vld [vmem:[%s2785_s2 + $0x8] sm:$0xff]   ;;  %v2478_v16 = vld [vmem:[%s469_s18] sm:$0xff]  ;;  %v2227_v35 = vld [vmem:[%s2785_s2 + $0xb0] sm:$0xff]  }
  0x11   : > { %2091 = vmatpush3.bf16.msra.mxu1 %v2212_v3  ;;  %v2225_v17 = vld [vmem:[%s2785_s2] sm:$0xff]   ;;  %v479_v18 = vpack.c.bf16 %v2478_v16, %v2478_v16  ;;  %v2228_v36 = vld [vmem:[%s2785_s2 + $0xa8] sm:$0xff]   ;;  %v2230_v38 = vld [vmem:[%s2785_s2 + $0x98] sm:$0xff]  }
  0x12   : > { %2071 = vmatpush3.bf16.msra.mxu0 %v2213_v4  ;;  %2092 = vmatprep.subr.bf16.mxu1 %v2314_v1  ;;  %v1902_v19 = vld [vmem:[%s2786_s3 + $0x1] ss:$0 sm:$0xff]  ;;  %v1876_v20 = vld [vmem:[%s2786_s3] ss:$0 sm:$0xff]  ;;  %v2231_v39 = vld [vmem:[%s2785_s2 + $0x90] sm:$0xff]  }
  0x13   : > { %2072 = vmatprep.subr.bf16.mxu0 %v2314_v1  ;;  %v2229_v37 = vld [vmem:[%s2785_s2 + $0xa0] sm:$0xff]   ;;  %v2232_v40 = vld [vmem:[%s2785_s2 + $0x88] sm:$0xff]  }
  0x14   : > { %v2233_v41 = vld [vmem:[%s2785_s2 + $0x80] sm:$0xff]  }
  0x15   : > { %2093 = vmatpush3.bf16.msra.mxu1 %v2214_v5  ;;  %v2552_v43 = vld [vmem:[%s472_s21] ss:$0 sm:$0xff]  ;;  %v1928_v55 = vld [vmem:[%s2786_s3 + $0x2] ss:$0 sm:$0xff] }
  0x16   : > { %2073 = vmatpush3.bf16.msra.mxu0 %v2215_v6  ;;  %2094 = vmatprep.subr.bf16.mxu1 %v2314_v1 }
  0x17   : > { %2074 = vmatprep.subr.bf16.mxu0 %v2314_v1 }
  0x19   : > { %2095 = vmatpush3.bf16.msra.mxu1 %v2216_v7 }
  0x1a   : > { %2075 = vmatpush3.bf16.msra.mxu0 %v2217_v8  ;;  %2096 = vmatprep.subr.bf16.mxu1 %v2314_v1 }
  0x1b   : > { %2076 = vmatprep.subr.bf16.mxu0 %v2314_v1 }
  0x1d   : > { %2097 = vmatpush3.bf16.msra.mxu1 %v2218_v9 }
  0x1e   : > { %2077 = vmatpush3.bf16.msra.mxu0 %v2219_v10  ;;  %2098 = vmatprep.subr.bf16.mxu1 %v2314_v1 }
  0x1f   : > { %2078 = vmatprep.subr.bf16.mxu0 %v2314_v1 }
  0x21   : > { %2099 = vmatpush3.bf16.msra.mxu1 %v2220_v11 }
  0x22   : > { %2079 = vmatpush3.bf16.msra.mxu0 %v2221_v12  ;;  %2100 = vmatprep.subr.bf16.mxu1 %v2314_v1 }
  0x23   : > { %2080 = vmatprep.subr.bf16.mxu0 %v2314_v1 }
  0x25   : > { %2101 = vmatpush3.bf16.msra.mxu1 %v2222_v13 }
  0x26   : > { %2081 = vmatpush3.bf16.msra.mxu0 %v2223_v14  ;;  %2102 = vmatprep.subr.bf16.mxu1 %v2314_v1 }
  0x27   : > { %2082 = vmatprep.subr.bf16.mxu0 %v2314_v1 }
  0x29   : > { %2103 = vmatpush3.bf16.msra.mxu1 %v2224_v15 }
  0x2a   : > { %2083 = vmatpush3.bf16.msra.mxu0 %v2225_v17  ;;  %2128 = vmatprep.subr.bf16.mxu1 %v2314_v1 }
  0x2b   : > { %2108 = vmatprep.subr.bf16.mxu0 %v2314_v1 }
  0x2c   : > { %2105 = vmatmul.mubr.bf16.vlgmr.msra.gmra.mxu1 %v479_v18 }
  0x2d   : > { %2085 = vmatmul.mubr.bf16.vlgmr.msra.gmra.mxu0 %v479_v18  ;;  %2130 = vmatprep.mubr.msk.bf16.mxu1 %vm2315_vm0, %v2314_v1 }
  0x2e   : > { %2124 = vmatprep.mubr.msk.bf16.mxu0 %vm2315_vm0, %v2314_v1  ;;  %2109 = vmatpush3.bf16.msra.mxu0 %v2226_v34 }
  0x2f   : > { %2110 = vmatprep.subr.bf16.mxu0 %v2314_v1 }
  0x32   : > { %2111 = vmatpush3.bf16.msra.mxu0 %v2227_v35 }
  0x33   : > { %2112 = vmatprep.subr.bf16.mxu0 %v2314_v1 }
  0x36   : > { %2113 = vmatpush3.bf16.msra.mxu0 %v2228_v36 }
  0x37   : > { %2114 = vmatprep.subr.bf16.mxu0 %v2314_v1 }
  0x3a   : > { %2115 = vmatpush3.bf16.msra.mxu0 %v2229_v37 }
  0x3b   : > { %2116 = vmatprep.subr.bf16.mxu0 %v2314_v1 }
  0x3e   : > { %2117 = vmatpush3.bf16.msra.mxu0 %v2230_v38 }
  0x3f   : > { %2118 = vmatprep.subr.bf16.mxu0 %v2314_v1 }
  0x42   : > { %2119 = vmatpush3.bf16.msra.mxu0 %v2231_v39 }
  0x43   : > { %2120 = vmatprep.subr.bf16.mxu0 %v2314_v1 }
  0x46   : > { %2121 = vmatpush3.bf16.msra.mxu0 %v2232_v40 }
  0x47   : > { %2122 = vmatprep.subr.bf16.mxu0 %v2314_v1 }
  0x4a   : > { %2123 = vmatpush3.bf16.msra.mxu0 %v2233_v41 }
  0x4b   : > { %2176 = vmatprep.subr.bf16.mxu0 %v2314_v1 }
  0x4d   : > { %2125 = vmatmul.mubr.bf16.vlgmr.msra.gmra.mxu0 %v479_v18 }
  0x4e   : > { %2192 = vmatprep.mubr.msk.bf16.mxu0 %vm2315_vm0, %v2314_v1 }
  0xec   : > { %v699_v21 = vpop.f32.mrf.mxu1 }
  0xed   : > { %v700_v22 = vadd.f32 %v1902_v19, %v699_v21  ;;  %v586_v23 = vpop.f32.mrf.mxu0 }
  0xee   : > { %v2106_v24 = vpop.f32.mrf.mxu1  ;;  %v587_v25 = vadd.f32 %v1876_v20, %v586_v23 }
  0xef   : > { %v2499_v26 = vpack.c.bf16 %v700_v22, %v700_v22  ;;  %v2086_v27 = vpop.f32.mrf.mxu0 }
  0xf0   : > { %v702_v28 = vpop.f32.mrf.mxu1  ;;  %v2501_v29 = vpack.c.bf16 %v587_v25, %v587_v25 }
  0xf1   : > { %940 = vrot.lane.b32.xlu1 %v2499_v26, %s2316_s28  ;;  %v826_v30 = vsel %vm821_vm1, %v2499_v26, 0  ;;  %v589_v31 = vpop.f32.mrf.mxu0 }
  0xf2   : > { %v2107_v32 = vpop.f32.mrf.mxu1  ;;  %2129 = vmatpush3.bf16.xpose.msra.mxu1 %v826_v30 }
  0xf3   : > { %v2087_v33 = vpop.f32.mrf.mxu0  ;;  %2134 = vmatprep.subr.bf16.mxu1 %v2314_v1 }
  0xf5   : > { %937 = vrot.lane.b32.xlu1 %v2501_v29, %s2316_s28 }
  0xf9   : > { %2131 = vmatmul.mubr.msk.bf16.vlgmr.msra.gmra.mxu1 %vm821_vm1, %v2501_v29 }
  0xfa   : > { %2136 = vmatprep.mubr.msk.bf16.mxu1 %vm2315_vm0, %v2314_v1 }
 0x10d   : > { %v812_v56 = vpop.f32.mrf.mxu0 }
 0x10e   : > { %v813_v57 = vadd.f32 %v1928_v55, %v812_v56 }
 0x10f   : > { %v2126_v58 = vpop.f32.mrf.mxu0 }
 0x110   : > { %v2560_v59 = vpack.c.bf16 %v813_v57, %v813_v57 }
 0x111   : > { %v815_v60 = vpop.f32.mrf.mxu0 }
 0x112   : > { %v894_v61 = vsel %vm892_vm3, %v2560_v59, 0 }
 0x113   : > { %v2127_v62 = vpop.f32.mrf.mxu0  ;;  %2135 = vmatpush3.bf16.msra.mxu1 %v894_v61 }
 0x114   : > { %2140 = vmatprep.subr.bf16.mxu1 %v2314_v1 }
 0x163   : > { %v941_v3 = vpop.permute.xlu1 %940 }
 0x164   : > { %v946_v5 = vsel %vm821_vm1, %v941_v3, 0 }
 0x167   : > { %v938_v6 = vpop.permute.xlu1 %937 }
 0x1b9   : > { %v862_v42 = vpop.f32.mrf.mxu1 }
 0x1ba   : > { %v868_v44 = vmul.f32 0.17677669, %v862_v42 }
 0x1bb   : > { %v2132_v45 = vpop.f32.mrf.mxu1 }
 0x1bc   : > { %v875_v46 = vadd.f32 %v2552_v43, %v868_v44 }
 0x1bd   : > { %v865_v47 = vpop.f32.mrf.mxu1 }
 0x1be   : > { %v877_v48 = vsel %vm876_vm2, %v875_v46, -inf }
 0x1bf   : > { %878 = vmax.xlane.f32.xlu0 %v877_v48  ;;  %v2133_v49 = vpop.f32.mrf.mxu1 }
 0x248   : > { %v879_v50 = vpop.xlane.xlu0 %878 }
 0x249   : > { %v880_v51 = vsub.f32 %v875_v46, %v879_v50 }
 0x24b   : > { %v881_v52 = vmul.f32 1.442695, %v880_v51 }
 0x24d   : > { %2282 = vpow2.f32 %v881_v52 }
 0x25a   : > { %v2283_v53 = vpop.eup %2282 }
 0x25b   : > { %v883_v54 = vsel %vm876_vm2, %v2283_v53, 0.0 }
 0x25c   : > { %884 = vadd.xlane.f32.xlu0 %v883_v54 }
 0x2e5   : > { %v885_v63 = vpop.xlane.xlu0 %884 }
 0x2e6   : > { %2284 = vrcp.f32 %v885_v63 }
 0x2f3   : > { %v2285_v0 = vpop.eup %2284 }
 0x2f4   : > { %v887_v2 = vmul.f32 %v2285_v0, %v2283_v53 }
 0x2f6   : > { %v888_v4 = vpack.c.bf16 %v887_v2, %v887_v2 }
 0x2f8   : > { %2137 = vmatmul.mubr.msk.bf16.vlgmr.msra.gmra.mxu1 %vm876_vm2, %v888_v4 }
 0x2f9   : > { %2141 = vmatpush3.bf16.xpose.msra.mxu1 %v946_v5  ;;  %2142 = vmatprep.mubr.msk.bf16.mxu1 %vm2315_vm0, %v2314_v1 }
 0x2fa   : > { %2146 = vmatprep.subr.bf16.mxu1 %v2314_v1 }
 0x300   : > { %2143 = vmatmul.mubr.msk.bf16.vlgmr.msra.gmra.mxu1 %vm821_vm1, %v938_v6 }
 0x301   : > { %2148 = vmatprep.mubr.msk.bf16.mxu1 %vm2315_vm0, %v2314_v1 }
 0x3b8   : > { %v2573_v7 = vpop.f32.mrf.mxu1 }
 0x3ba   : > { %v2138_v8 = vpop.f32.mrf.mxu1 }
 0x3bc   : > { %v933_v9 = vpop.f32.mrf.mxu1 }
 0x3be   : > { %v2139_v10 = vpop.f32.mrf.mxu1 }
 0x3c0   : > { %v982_v11 = vpop.f32.mrf.mxu1 }
 0x3c1   : > { %v988_v12 = vmul.f32 0.17677669, %v982_v11 }
 0x3c2   : > { %v2144_v13 = vpop.f32.mrf.mxu1 }
 0x3c3   : > { %v989_v14 = vadd.f32 %v2552_v43, %v988_v12 }
 0x3c4   : > { %v985_v15 = vpop.f32.mrf.mxu1 }
 0x3c5   : > { %v990_v17 = vsel %vm876_vm2, %v989_v14, -inf }
 0x3c6   : > { %991 = vmax.xlane.f32.xlu0 %v990_v17  ;;  %v2145_v18 = vpop.f32.mrf.mxu1 }
 0x3dc   : > { %1003 = vrot.lane.b32.xlu0 %v2560_v59, %s2316_s28 }
 0x3e0   : > { %1053 = vrot.lane.b32.xlu0 %v2499_v26, %s2317_s25 }
 0x3e4   : > { %1051 = vrot.lane.b32.xlu0 %v2501_v29, %s2317_s25 }
 0x44f   : > { %v992_v19 = vpop.xlane.xlu0 %991 }
 0x450   : > { %v993_v20 = vsub.f32 %v989_v14, %v992_v19  ;;  %v2234_v19 = vld [vmem:[%s2787_s4 + $0x38] sm:$0xff]  }
 0x451   : > { %2177 = vmatpush3.bf16.msra.mxu0 %v2234_v19  ;;  %v2273_v19 = vld [vmem:[%s2793_s10 + $0x20] sm:$0xff]  }
 0x452   : > { %v994_v21 = vmul.f32 1.442695, %v993_v20  ;;  %v2235_v20 = vld [vmem:[%s2787_s4 + $0x30] sm:$0xff]   ;;  %2178 = vmatprep.subr.bf16.mxu0 %v2314_v1 }
 0x453   : > { %v1004_v22 = vpop.permute.xlu0 %1003 }
 0x454   : > { %2286 = vpow2.f32 %v994_v21  ;;  %v1009_v23 = vsel %vm892_vm3, %v1004_v22, 0  ;;  %v2236_v21 = vld [vmem:[%s2787_s4 + $0x28] sm:$0xff]   ;;  %v2237_v22 = vld [vmem:[%s2787_s4 + $0x20] sm:$0xff]  }
 0x455   : > { %2147 = vmatpush3.bf16.msra.mxu1 %v1009_v23  ;;  %2179 = vmatpush3.bf16.msra.mxu0 %v2235_v20  ;;  %v2238_v23 = vld [vmem:[%s2787_s4 + $0x18] sm:$0xff]  }
 0x456   : > { %2152 = vmatprep.subr.bf16.mxu1 %v2314_v1  ;;  %2180 = vmatprep.subr.bf16.mxu0 %v2314_v1  ;;  %v2274_v20 = vld [vmem:[%s2793_s10 + $0x58] sm:$0xff]  }
 0x457   : > { %v1054_v31 = vpop.permute.xlu0 %1053 }
 0x458   : > { %v1059_v33 = vsel %vm821_vm1, %v1054_v31, 0 }
 0x459   : > { %2181 = vmatpush3.bf16.msra.mxu0 %v2236_v21  ;;  %v2275_v21 = vld [vmem:[%s2793_s10 + $0x18] sm:$0xff]  }
 0x45a   : > { %2182 = vmatprep.subr.bf16.mxu0 %v2314_v1 }
 0x45b   : > { %v1052_v35 = vpop.permute.xlu0 %1051 }
 0x45d   : > { %2183 = vmatpush3.bf16.msra.mxu0 %v2237_v22  ;;  %v2276_v22 = vld [vmem:[%s2793_s10 + $0x50] sm:$0xff]  }
 0x45e   : > { %2184 = vmatprep.subr.bf16.mxu0 %v2314_v1 }
 0x461   : > { %v2287_v24 = vpop.eup %2286  ;;  %2185 = vmatpush3.bf16.msra.mxu0 %v2238_v23  ;;  %v2277_v23 = vld [vmem:[%s2793_s10 + $0x10] sm:$0xff]  }
 0x462   : > { %v996_v25 = vsel %vm876_vm2, %v2287_v24, 0.0  ;;  %2186 = vmatprep.subr.bf16.mxu0 %v2314_v1 }
 0x463   : > { %997 = vadd.xlane.f32.xlu1 %v996_v25  ;;  %v2240_v25 = vld [vmem:[%s2787_s4 + $0x8] sm:$0xff]  }
 0x474   : > { %1115 = vrot.lane.b32.xlu1 %v2560_v59, %s2317_s25 }
 0x4ec   : > { %v998_v27 = vpop.xlane.xlu1 %997 }
 0x4ed   : > { %2288 = vrcp.f32 %v998_v27  ;;  %v2241_v27 = vld [vmem:[%s2787_s4] sm:$0xff]  }
 0x4f0   : > { %v1116_v34 = vpop.permute.xlu1 %1115 }
 0x4f1   : > { %v1121_v36 = vsel %vm892_vm3, %v1116_v34, 0 }
 0x4fa   : > { %v2289_v28 = vpop.eup %2288 }
 0x4fb   : > { %v1000_v30 = vmul.f32 %v2289_v28, %v2287_v24  ;;  %v2239_v24 = vld [vmem:[%s2787_s4 + $0x10] sm:$0xff]  }
 0x4fc   : > { %2187 = vmatpush3.bf16.msra.mxu0 %v2239_v24  ;;  %v2278_v24 = vld [vmem:[%s2793_s10 + $0x48] sm:$0xff]  }
 0x4fd   : > { %v1001_v32 = vpack.c.bf16 %v1000_v30, %v1000_v30  ;;  %2188 = vmatprep.subr.bf16.mxu0 %v2314_v1 }
 0x4ff   : > { %2149 = vmatmul.mubr.msk.bf16.vlgmr.msra.gmra.mxu1 %vm876_vm2, %v1001_v32 }
 0x500   : > { %2153 = vmatpush3.bf16.xpose.msra.mxu1 %v1059_v33  ;;  %2154 = vmatprep.mubr.msk.bf16.mxu1 %vm2315_vm0, %v2314_v1 }
 0x501   : > { %2158 = vmatprep.subr.bf16.mxu1 %v2314_v1  ;;  %2189 = vmatpush3.bf16.msra.mxu0 %v2240_v25  ;;  %v2279_v25 = vld [vmem:[%s2793_s10 + $0x8] sm:$0xff]  }
 0x502   : > { %2190 = vmatprep.subr.bf16.mxu0 %v2314_v1 }
 0x505   : > { %2191 = vmatpush3.bf16.msra.mxu0 %v2241_v27  ;;  %v2280_v27 = vld [vmem:[%s2793_s10 + $0x40] sm:$0xff]  }
 0x507   : > { %2155 = vmatmul.mubr.msk.bf16.vlgmr.msra.gmra.mxu1 %vm821_vm1, %v1052_v35 }
 0x508   : > { %2159 = vmatpush3.bf16.msra.mxu1 %v1121_v36  ;;  %2160 = vmatprep.mubr.msk.bf16.mxu1 %vm2315_vm0, %v2314_v1 }
 0x509   : > { %2164 = vmatprep.subr.bf16.mxu1 %v2314_v1 }
 0x5bf   : > { %v1045_v37 = vpop.f32.mrf.mxu1 }
 0x5c1   : > { %v2150_v38 = vpop.f32.mrf.mxu1 }
 0x5c3   : > { %v1048_v39 = vpop.f32.mrf.mxu1 }
 0x5c4   : > { %v1946_v39 = vld [vmem:[%s2788_s5] ss:$0 sm:$0xff] }
 0x5c5   : > { %v2151_v40 = vpop.f32.mrf.mxu1 }
 0x5c7   : > { %v1095_v41 = vpop.f32.mrf.mxu1 }
 0x5c8   : > { %v1101_v42 = vmul.f32 0.17677669, %v1095_v41 }
 0x5c9   : > { %v2156_v44 = vpop.f32.mrf.mxu1 }
 0x5ca   : > { %v1102_v45 = vadd.f32 %v2552_v43, %v1101_v42 }
 0x5cb   : > { %v1098_v46 = vpop.f32.mrf.mxu1 }
 0x5cc   : > { %v1103_v47 = vsel %vm876_vm2, %v1102_v45, -inf }
 0x5cd   : > { %1104 = vmax.xlane.f32.xlu0 %v1103_v47  ;;  %v2157_v48 = vpop.f32.mrf.mxu1  ;;  %v2244_v47 = vld [vmem:[%s2791_s8 + $0x74] ss:$8 sps:$4 sm:$0xff]  }
 0x5ce   : > { %v2247_v48 = vld [vmem:[%s2791_s8 + $0x64] ss:$8 sps:$4 sm:$0xff]  }
 0x656   : > { %v1105_v49 = vpop.xlane.xlu0 %1104 }
 0x657   : > { %v1106_v50 = vsub.f32 %v1102_v45, %v1105_v49 }
 0x659   : > { %v1107_v51 = vmul.f32 1.442695, %v1106_v50 }
 0x65b   : > { %2290 = vpow2.f32 %v1107_v51 }
 0x668   : > { %v2291_v52 = vpop.eup %2290 }
 0x669   : > { %v1109_v53 = vsel %vm876_vm2, %v2291_v52, 0.0 }
 0x66a   : > { %1110 = vadd.xlane.f32.xlu1 %v1109_v53  ;;  %v2250_v53 = vld [vmem:[%s2791_s8 + $0x54] ss:$8 sps:$4 sm:$0xff]  }
 0x67b   : > { %1165 = vrot.lane.b32.xlu1 %v2499_v26, %s2318_s26 }
 0x67f   : > { %1163 = vrot.lane.b32.xlu1 %v2501_v29, %s2318_s26 }
 0x6f3   : > { %v1111_v54 = vpop.xlane.xlu1 %1110 }
 0x6f4   : > { %2292 = vrcp.f32 %v1111_v54  ;;  %v2248_v54 = vld [vmem:[%s2791_s8 + $0x50] ss:$8 sps:$4 sm:$0xff]  }
 0x6f7   : > { %v1166_v57 = vpop.permute.xlu1 %1165 }
 0x6f8   : > { %v1171_v60 = vsel %vm821_vm1, %v1166_v57, 0  ;;  %v2256_v57 = vld [vmem:[%s2791_s8 + $0x34] ss:$8 sps:$4 sm:$0xff]  }
 0x6fb   : > { %v1164_v61 = vpop.permute.xlu1 %1163 }
 0x701   : > { %v2293_v55 = vpop.eup %2292 }
 0x702   : > { %v1113_v56 = vmul.f32 %v2293_v55, %v2291_v52  ;;  %v2251_v55 = vld [vmem:[%s2791_s8 + $0x40] ss:$8 sps:$4 sm:$0xff]  }
 0x704   : > { %v1114_v58 = vpack.c.bf16 %v1113_v56, %v1113_v56  ;;  %v2253_v56 = vld [vmem:[%s2791_s8 + $0x44] ss:$8 sps:$4 sm:$0xff]  }
 0x706   : > { %2161 = vmatmul.mubr.msk.bf16.vlgmr.msra.gmra.mxu1 %vm876_vm2, %v1114_v58  ;;  %v2254_v58 = vld [vmem:[%s2791_s8 + $0x30] ss:$8 sps:$4 sm:$0xff]  }
 0x707   : > { %2165 = vmatpush3.bf16.xpose.msra.mxu1 %v1171_v60  ;;  %2166 = vmatprep.mubr.msk.bf16.mxu1 %vm2315_vm0, %v2314_v1  ;;  %v2319_v60 = vmov 0  }
 0x708   : > { %2170 = vmatprep.subr.bf16.mxu1 %v2314_v1 }
 0x70e   : > { %2167 = vmatmul.mubr.msk.bf16.vlgmr.msra.gmra.mxu1 %vm821_vm1, %v1164_v61  ;;  %v2259_v61 = vld [vmem:[%s2791_s8 + $0x24] ss:$8 sps:$4 sm:$0xff]  }
 0x70f   : > { %2172 = vmatprep.mubr.msk.bf16.mxu1 %vm2315_vm0, %v2314_v1 }
 0x7c6   : > { %v1157_v26 = vpop.f32.mrf.mxu1 }
 0x7c8   : > { %v2162_v29 = vpop.f32.mrf.mxu1 }
 0x7c9   : > { %v2262_v29 = vld [vmem:[%s2791_s8 + $0x14] ss:$8 sps:$4 sm:$0xff]  }
 0x7ca   : > { %v1160_v62 = vpop.f32.mrf.mxu1 }
 0x7cb   : > { %v2260_v62 = vld [vmem:[%s2791_s8 + $0x10] ss:$8 sps:$4 sm:$0xff]  }
 0x7cc   : > { %v2163_v63 = vpop.f32.mrf.mxu1 }
 0x7cd   : > { %v2265_v63 = vld [vmem:[%s2791_s8 + $0x4] ss:$8 sps:$4 sm:$0xff]  }
 0x7ce   : > { %v1207_v0 = vpop.f32.mrf.mxu1 }
 0x7cf   : > { %v1213_v2 = vmul.f32 0.17677669, %v1207_v0  ;;  %v2263_v0 = vld [vmem:[%s2791_s8] ss:$8 sps:$4 sm:$0xff]  }
 0x7d0   : > { %v2168_v3 = vpop.f32.mrf.mxu1 }
 0x7d1   : > { %v1214_v4 = vadd.f32 %v2552_v43, %v1213_v2 }
 0x7d2   : > { %v1210_v5 = vpop.f32.mrf.mxu1 }
 0x7d3   : > { %v1215_v6 = vsel %vm876_vm2, %v1214_v4, -inf }
 0x7d4   : > { %1216 = vmax.xlane.f32.xlu0 %v1215_v6  ;;  %v2169_v8 = vpop.f32.mrf.mxu1  ;;  %v1955_v6 = vld [vmem:[%s2789_s6] ss:$0 sm:$0xff] }
 0x7ea   : > { %1227 = vrot.lane.b32.xlu0 %v2560_v59, %s2318_s26 }
 0x7ee   : > { %1276 = vrot.lane.b32.xlu0 %v1045_v37, %s2318_s26 }
 0x7f2   : > { %1280 = vrot.lane.b32.xlu0 %v1157_v26, %s2317_s25  ;;  %v2257_v26 = vld [vmem:[%s2791_s8 + $0x20] ss:$8 sps:$4 sm:$0xff]  }
 0x85d   : > { %v1217_v9 = vpop.xlane.xlu0 %1216 }
 0x85e   : > { %v1218_v10 = vsub.f32 %v1214_v4, %v1217_v9  ;;  %v1956_v9 = vld [vmem:[%s2790_s7] ss:$0 sm:$0xff] }
 0x860   : > { %v1219_v11 = vmul.f32 1.442695, %v1218_v10 }
 0x861   : > { %v1228_v12 = vpop.permute.xlu0 %1227 }
 0x862   : > { %2294 = vpow2.f32 %v1219_v11  ;;  %v1233_v13 = vsel %vm892_vm3, %v1228_v12, 0 }
 0x863   : > { %2171 = vmatpush3.bf16.msra.mxu1 %v1233_v13  ;;  %v2266_v13 = vld [vmem:[%s2793_s10 + $0x78] sm:$0xff]  }
 0x864   : > { %1542 = vmatprep.subr.bf16.mxu1 %v2244_v47  ;;  %2046 = vmatprep.subr.bf16.mxu0 %v2266_v13 }
 0x865   : > { %v1277_v33 = vpop.permute.xlu0 %1276 }
 0x866   : > { %v1287_v35 = vsel %vm821_vm1, %v2573_v7, %v1277_v33  ;;  %v2242_v7 = vld [vmem:[%s2791_s8 + $0x70] ss:$8 sps:$4 sm:$0xff]   ;;  %v1450_v33 = vld [vmem:[%s2792_s9] sm:$0x3] }
 0x869   : > { %v1281_v34 = vpop.permute.xlu0 %1280 }
 0x86a   : > { %v1289_v36 = vsel %vm1288_vm4, %v1287_v35, %v1281_v34 }
 0x86f   : > { %v2295_v14 = vpop.eup %2294 }
 0x870   : > { %v1221_v43 = vsel %vm876_vm2, %v2295_v14, 0.0 }
 0x871   : > { %1222 = vadd.xlane.f32.xlu1 %v1221_v43  ;;  %v2268_v43 = vld [vmem:[%s2793_s10 + $0x70] sm:$0xff]  }
 0x8fa   : > { %v1223_v15 = vpop.xlane.xlu1 %1222 }
 0x8fb   : > { %2296 = vrcp.f32 %v1223_v15  ;;  %v2269_v15 = vld [vmem:[%s2793_s10 + $0x30] sm:$0xff]  }
 0x908   : > { %v2297_v17 = vpop.eup %2296 }
 0x909   : > { %v1225_v18 = vmul.f32 %v2297_v17, %v2295_v14  ;;  %v2267_v14 = vld [vmem:[%s2793_s10 + $0x38] sm:$0xff]   ;;  %v2270_v17 = vld [vmem:[%s2793_s10 + $0x68] sm:$0xff]  }
 0x90b   : > { %v1226_v59 = vpack.c.bf16 %v1225_v18, %v1225_v18  ;;  %v2271_v18 = vld [vmem:[%s2793_s10 + $0x28] sm:$0xff]  }
 0x90d   : > { %2173 = vmatmul.mubr.msk.bf16.vlgmr.msra.gmra.mxu1 %vm876_vm2, %v1226_v59  ;;  %v2272_v59 = vld [vmem:[%s2793_s10 + $0x60] sm:$0xff]  }
 0x90e   : > { %1543 = vmatpush1.bf16.msra.mxu1 %v2242_v7  ;;  %1574 = vmatprep.mubr.bf16.mxu1 %v2319_v60 }
 0x90f   : > { %1544 = vmatprep.subr.bf16.mxu1 %v2247_v48 }
 0x9cd   : > { %v1269_v28 = vpop.f32.mrf.mxu1 }
 0x9ce   : > { %1284 = vrot.lane.b32.xlu0 %v1269_v28, %s2316_s28  ;;  %v2281_v28 = vld [vmem:[%s2793_s10] sm:$0xff]   ;;  %s476_s28 = scalar_lea.vmem %s2797_s14, %s1874_s23 }
 0x9cf   : > { %v2174_v30 = vpop.f32.mrf.mxu1 }
 0x9d0   : > { %v1452_v30 = vlaneseq }
 0x9d1   : > { %v1272_v31 = vpop.f32.mrf.mxu1 }
 0x9d2   : > { %v1453_v31 = vshrl.u32 %v1452_v30, 7 }
 0x9d3   : > { %v2175_v32 = vpop.f32.mrf.mxu1 }
 0x9d4   : > { %v1454_v32 = vsub.s32 0, %v1453_v31  ;;  %v1458_v34 = vsub.s32 1, %v1453_v31 }
 0x9d6   : > { %v1455_v35 = vrot.slane %v1450_v33, %v1454_v32 }
 0xa40   : > { %v1285_v1 = vpop.permute.xlu0 %1284 }
 0xa41   : > { %v1291_v37 = vsel %vm1290_vm5, %v1289_v36, %v1285_v1  ;;  %v1459_v36 = vrot.slane %v1450_v33, %v1458_v34 }
 0xa42   : > { %v1292_v38 = vpack.c.bf16 %v1291_v37, %v1291_v37 }
 0xa44   : > { %2193 = vmatmul.mubr.bf16.vlgmr.msra.gmra.mxu0 %v1292_v38 }
 0xa45   : > { %2047 = vmatpush3.bf16.msra.mxu0 %v2267_v14 }
 0xa46   : > { %2048 = vmatprep.subr.bf16.mxu0 %v2268_v43  ;;  %v1990_v43 = vld [vmem:[%s2795_s12] ss:$0 sm:$0xff] }
 0xa49   : > { %2049 = vmatpush3.bf16.msra.mxu0 %v2269_v15 }
 0xa4a   : > { %2050 = vmatprep.subr.bf16.mxu0 %v2270_v17 }
 0xa4d   : > { %2051 = vmatpush3.bf16.msra.mxu0 %v2271_v18 }
 0xa4e   : > { %2052 = vmatprep.subr.bf16.mxu0 %v2272_v59 }
 0xa51   : > { %2053 = vmatpush3.bf16.msra.mxu0 %v2273_v19 }
 0xa52   : > { %2054 = vmatprep.subr.bf16.mxu0 %v2274_v20 }
 0xa55   : > { %2055 = vmatpush3.bf16.msra.mxu0 %v2275_v21 }
 0xa56   : > { %2056 = vmatprep.subr.bf16.mxu0 %v2276_v22 }
 0xa59   : > { %2057 = vmatpush3.bf16.msra.mxu0 %v2277_v23 }
 0xa5a   : > { %2058 = vmatprep.subr.bf16.mxu0 %v2278_v24 }
 0xa5d   : > { %2059 = vmatpush3.bf16.msra.mxu0 %v2279_v25 }
 0xa5e   : > { %2060 = vmatprep.subr.bf16.mxu0 %v2280_v27 }
 0xa61   : > { %2061 = vmatpush3.bf16.msra.mxu0 %v2281_v28 }
 0xb04   : > { %v1398_v40 = vpop.f32.mrf.mxu0 }
 0xb05   : > { %v1399_v41 = vadd.f32 %v1946_v39, %v1398_v40 }
 0xb06   : > { %v2194_v42 = vpop.f32.mrf.mxu0 }
 0xb07   : > { %v1404_v44 = vadd.f32 %v1399_v41, %v2478_v16  ;;  %v2245_v16 = vld [vmem:[%s2791_s8 + $0x60] ss:$8 sps:$4 sm:$0xff]  }
 0xb08   : > { %v1401_v45 = vpop.f32.mrf.mxu0  ;;  %1545 = vmatpush1.bf16.msra.mxu1 %v2245_v16 }
 0xb09   : > { %1407 = vadd.xlane.f32.xlu1 %v1404_v44  ;;  %1546 = vmatprep.subr.bf16.mxu1 %v2250_v53 }
 0xb0a   : > { %v2195_v46 = vpop.f32.mrf.mxu0 }
 0xb0c   : > { %1547 = vmatpush1.bf16.msra.mxu1 %v2248_v54 }
 0xb0d   : > { %1548 = vmatprep.subr.bf16.mxu1 %v2253_v56 }
 0xb10   : > { %1549 = vmatpush1.bf16.msra.mxu1 %v2251_v55 }
 0xb11   : > { %1550 = vmatprep.subr.bf16.mxu1 %v2256_v57 }
 0xb14   : > { %1551 = vmatpush1.bf16.msra.mxu1 %v2254_v58 }
 0xb15   : > { %1552 = vmatprep.subr.bf16.mxu1 %v2259_v61 }
 0xb18   : > { %1553 = vmatpush1.bf16.msra.mxu1 %v2257_v26 }
 0xb19   : > { %1554 = vmatprep.subr.bf16.mxu1 %v2262_v29  ;;  %v1973_v29 = vld [vmem:[%s2794_s11] ss:$0 sm:$0xff] }
 0xb1c   : > { %1555 = vmatpush1.bf16.msra.mxu1 %v2260_v62 }
 0xb1d   : > { %1556 = vmatprep.subr.bf16.mxu1 %v2265_v63 }
 0xb20   : > { %1557 = vmatpush1.bf16.msra.mxu1 %v2263_v0 }
 0xb92   : > { %v1408_v49 = vpop.xlane.xlu1 %1407 }
 0xb93   : > { %v1410_v50 = vmul.f32 0.0078125, %v1408_v49 }
 0xb95   : > { %v1411_v51 = vsub.f32 %v1404_v44, %v1410_v50 }
 0xb97   : > { %v1412_v52 = vmul.f32 %v1411_v51, %v1411_v51 }
 0xb99   : > { %1413 = vadd.xlane.f32.xlu0 %v1412_v52 }
 0xc22   : > { %v1414_v2 = vpop.xlane.xlu0 %1413 }
 0xc23   : > { %v1415_v3 = vmul.f32 0.0078125, %v1414_v2 }
 0xc25   : > { %v1416_v4 = vadd.f32 1e-12, %v1415_v3 }
 0xc27   : > { %2298 = vrsqrt.f32 %v1416_v4 }
 0xc34   : > { %v2299_v5 = vpop.eup %2298 }
 0xc35   : > { %v1418_v8 = vmul.f32 %v2299_v5, %v1411_v51 }
 0xc37   : > { %v1425_v10 = vmul.f32 %v1955_v6, %v1418_v8 }
 0xc39   : > { %v2710_v11 = vadd.f32 %v1956_v9, %v1425_v10 }
 0xc3b   : > { %v1433_v12 = vpack.c.bf16 %v2710_v11, %v2710_v11 }
 0xc3d   : > { %1575 = vmatmul.mubr.bf16.vlgmr.msra.gmra.mxu1 %v1433_v12 }
 0xcfd   : > { %v1576_v1 = vpop.f32.mrf.mxu1 }
 0xcfe   : > { %v1577_v37 = vadd.f32 %v1576_v1, %v1455_v35 }
 0xcff   : > { %v1578_v38 = vpop.f32.mrf.mxu1 }
 0xd00   : > { %v1585_v39 = vmul.f32 0.044715, %v1577_v37  ;;  %v1579_v40 = vadd.f32 %v1578_v38, %v1459_v36  ;;  %v1583_v54 = vmul.f32 0.5, %v1577_v37 }
 0xd01   : > { %v1580_v41 = vpop.f32.mrf.mxu1 }
 0xd02   : > { %v1587_v42 = vmul.f32 %v1585_v39, %v1577_v37  ;;  %v1586_v44 = vmul.f32 0.044715, %v1579_v40  ;;  %v1584_v55 = vmul.f32 0.5, %v1579_v40 }
 0xd03   : > { %v1581_v45 = vpop.f32.mrf.mxu1 }
 0xd04   : > { %v1589_v46 = vmul.f32 %v1587_v42, %v1577_v37  ;;  %v1588_v7 = vmul.f32 %v1586_v44, %v1579_v40 }
 0xd06   : > { %v1591_v47 = vadd.f32 %v1589_v46, %v1577_v37  ;;  %v1590_v48 = vmul.f32 %v1588_v7, %v1579_v40 }
 0xd08   : > { %v1593_v16 = vmul.f32 0.7978846, %v1591_v47  ;;  %v1592_v49 = vadd.f32 %v1590_v48, %v1579_v40 }
 0xd0a   : > { %v1594_v50 = vmul.f32 0.7978846, %v1592_v49  ;;  %2300 = vtanh.f32 %v1593_v16 }
 0xd0c   : > { %2302 = vtanh.f32 %v1594_v50 }
 0xd17   : > { %v2301_v51 = vpop.eup %2300 }
 0xd18   : > { %v1597_v52 = vadd.f32 1.0, %v2301_v51 }
 0xd19   : > { %v2303_v53 = vpop.eup %2302 }
 0xd1a   : > { %v1598_v56 = vadd.f32 1.0, %v2303_v53  ;;  %v1599_v57 = vmul.f32 %v1597_v52, %v1583_v54 }
 0xd1c   : > { %v1600_v58 = vmul.f32 %v1598_v56, %v1584_v55  ;;  %v1601_v61 = vpack.c.bf16 %v1599_v57, %v1599_v57 }
 0xd1e   : > { %v1602_v60 = vpack.c.bf16 %v1600_v58, %v1600_v58 }
 0xd20   : > { %1770 = vmatprep.mubr.bf16.mxu0 %v1602_v60 }
 0xd21   : > { %1771 = vmatmul.mubr.bf16.vlgmr.msra.gmra.mxu0 %v1601_v61 }
 0xde1   : > { %v2062_v26 = vpop.f32.mrf.mxu0 }
 0xde3   : > { %v2063_v62 = vpop.f32.mrf.mxu0 }
 0xde4   : > { %v2064_v63 = vadd.f32 %v2063_v62, %v2062_v26 }
 0xde5   : > { %v2065_v0 = vpop.f32.mrf.mxu0 }
 0xde6   : > { %v1773_v2 = vadd.f32 %v2064_v63, %v1973_v29 }
 0xde7   : > { %v2066_v3 = vpop.f32.mrf.mxu0 }
 0xde8   : > { %v1778_v4 = vadd.f32 %v1773_v2, %v2710_v11  ;;  %v1991_v11 = vld [vmem:[%s2796_s13] ss:$0 sm:$0xff] }
 0xdea   : > { %1781 = vadd.xlane.f32.xlu1 %v1778_v4 }
 0xe73   : > { %v1782_v5 = vpop.xlane.xlu1 %1781 }
 0xe74   : > { %v1783_v6 = vmul.f32 0.0078125, %v1782_v5 }
 0xe76   : > { %v1784_v8 = vsub.f32 %v1778_v4, %v1783_v6 }
 0xe78   : > { %v1785_v9 = vmul.f32 %v1784_v8, %v1784_v8 }
 0xe7a   : > { %1786 = vadd.xlane.f32.xlu1 %v1785_v9 }
 0xf03   : > { %v1787_v10 = vpop.xlane.xlu1 %1786 }
 0xf04   : > { %v1788_v12 = vmul.f32 0.0078125, %v1787_v10 }
 0xf06   : > { %v1789_v13 = vadd.f32 1e-12, %v1788_v12 }
 0xf08   : > { %2304 = vrsqrt.f32 %v1789_v13 }
 0xf15   : > { %v2305_v14 = vpop.eup %2304 }
 0xf16   : > { %v1791_v15 = vmul.f32 %v2305_v14, %v1784_v8 }
 0xf18   : > { %v1798_v17 = vmul.f32 %v1990_v43, %v1791_v15 }
 0xf1a   : > { %v1805_v18 = vadd.f32 %v1991_v11, %v1798_v17 }
 0xf1c   : > { %1806 = vst [vmem:[%s476_s28] sm:$0xff] %v1805_v18 }
 0xf1d PF: > { %s24_s29 = sadd.s32 1, %s2312_s29  }
 0xf1e   : > { %p21_p4 = scmp.ge.s32.totalorder %s24_s29, 4  }
 0xf20   :  { %23 = sbr.rel (!%p21_p4) target bundleno = 1 (0x1), region = 113 }

// kernel: distilbert_class_forward.4
= control target key start
LH: loop header
LB: loop body
LE: loop exit
PB: predicated region body
PF: predicated region fallthrough
CT: control target
= control target key end

     0   :  { %19 = vsyncpa [#allocation3], 0  ;;  %s2931_s0 = inlined_call_operand.vmem [shape: f32[2,8,128], index: 0, kind: input, shape index: {}]   ;;  %s2932_s1 = inlined_call_operand.vmem [shape: f32[2,1,8], index: 1, kind: input, shape index: {}]   ;;  %s2933_s2 = inlined_call_operand.vmem [shape: bf16[3,128,128], index: 2, kind: input, shape index: {}]   ;;  %s2934_s3 = inlined_call_operand.vmem [shape: f32[3,1,128], index: 3, kind: input, shape index: {}]   ;;  %s2935_s4 = inlined_call_operand.hbm [shape: bf16[128,128], index: 4, kind: input, shape index: {}]   ;;  %s2936_s5 = inlined_call_operand.vmem [shape: f32[1,128], index: 5, kind: input, shape index: {}]   ;;  %s2937_s6 = inlined_call_operand.vmem [shape: f32[1,128], index: 6, kind: input, shape index: {}]   ;;  %s2938_s7 = inlined_call_operand.vmem [shape: f32[1,128], index: 7, kind: input, shape index: {}]   ;;  %s2939_s8 = inlined_call_operand.hbm [shape: bf16[128,256], index: 8, kind: input, shape index: {}]   ;;  %s2940_s9 = inlined_call_operand.vmem [shape: f32[1,256], index: 9, kind: input, shape index: {}]   ;;  %s2941_s10 = inlined_call_operand.hbm [shape: bf16[256,128], index: 10, kind: input, shape index: {}]   ;;  %s2942_s11 = inlined_call_operand.vmem [shape: f32[1,128], index: 11, kind: input, shape index: {}]   ;;  %s2943_s12 = inlined_call_operand.vmem [shape: f32[1,128], index: 12, kind: input, shape index: {}]   ;;  %s2944_s13 = inlined_call_operand.vmem [shape: f32[1,128], index: 13, kind: input, shape index: {}]   ;;  %s2945_s14 = inlined_call_operand.vmem [shape: f32[2,8,128], index: 14, kind: output, shape index: {}]  }
   0x1   :  { %20 = vsyncpa [#allocation5], 0  ;;  %s2604_s29 = smov 0  }
   0x2 LB: > { %s2516_s30 = smov [#allocation4]   ;;  %s2610_s16 = sadd.s32 4294967295, %s2514_s29   ;;  %s2514_s29 = sphi %s2604_s29, %s26_s29  }
   0x3   : > { %s401_s15 = sshll.u32 %s2516_s30, 4  ;;  %p1946_p0 = scmp.ge.s32.totalorder %s2514_s29, 1  ;;  %s402_s15 = int_to_ptr.vmem [resolvable:$true] %s401_s15 }
   0x4   : > { %p361_p1 = scmp.lt.s32.totalorder %s2514_s29, 3  ;;  %p2299_p2 = scmp.eq.s32.totalorder %s2610_s16, 0 }
   0x5   : > { %s2517_s18 = smov [#allocation2]   ;;  %s2518_s21 = smov [#allocation6]  }
   0x6   : > { %p2615_p3 = pnand %p1946_p0, %p361_p1  ;;  %s379_s19 = sshll.u32 %s2517_s18, 4  ;;  %s2621_s19 = int_to_ptr.vmem [resolvable:$true] %s379_s19 }
   0x7   : > { %s2629_s22 = sshll.u32 %s2518_s21, 4  ;;  %s2433_s23 = scalar_lea.vmem %s402_s15, 2048  ;;  %s418_s22 = int_to_ptr.vmem [resolvable:$true] %s2629_s22 }
   0x8   : > { %p2289_p4 = pneg %p2615_p3  ;;  %p2434_p7 = scmp.ne.s32.totalorder %s402_s15, %s2433_s23 }
   0x9   : > { %p2441_p10 = scmp.lt.s32.totalorder %s402_s15, %s402_s15  ;;  %p2442_p11 = scmp.lt.s32.totalorder %s2433_s23, %s2433_s23 }
   0xa   : > { %p2625_p5 = pnand %p2299_p2, %p2289_p4 }
   0xb   : > { %p2443_p12 = por %p2442_p11, %p2441_p10 }
   0xc   : > { %p2424_p6 = pneg %p2625_p5 }
   0xe   : > { %p2436_p8 = pnand %p2434_p7, %p2424_p6 }
  0x10   : > { %p2437_p9 = pneg %p2436_p8 }
  0x12   : > { %p2444_p13 = pnand %p2443_p12, %p2437_p9 }
  0x14   : > { %2447 = shalt.err (!%p2444_p13)
}
  0x15   : > { %s2519_s24 = smov 128   ;;  %s2520_s25 = smov 8  }
  0x16   : > { %2295 = dma.hbm_to_vmem [thread:$0]  (!%p2625_p5), %s2939_s8, 2048, %s402_s15, [#allocation5], %s2519_s24, %s2519_s24, %s2520_s25  }
  0x17   : > { %s2459_s28 = scalar_lea.vmem %s2621_s19, 1024  ;;  %p2467_p7 = scmp.lt.s32.totalorder %s2621_s19, %s2621_s19 }
  0x18   : > { %p2460_p0 = scmp.ne.s32.totalorder %s2621_s19, %s2459_s28  ;;  %p2468_p8 = scmp.lt.s32.totalorder %s2459_s28, %s2459_s28 }
  0x1a   : > { %p2462_p1 = pnand %p2460_p0, %p2424_p6  ;;  %p2469_p9 = por %p2468_p8, %p2467_p7 }
  0x1c   : > { %p2463_p4 = pneg %p2462_p1 }
  0x1e   : > { %p2470_p10 = pnand %p2469_p9, %p2463_p4 }
  0x20   : > { %2473 = shalt.err (!%p2470_p10)
}
  0x21   : > { %s2521_s30 = smov 64   ;;  %s2522_s18 = smov 4  }
  0x22   : > { %2292 = dma.hbm_to_vmem [thread:$0]  (!%p2625_p5), %s2935_s4, 1024, %s2621_s19, [#allocation3], %s2521_s30, %s2521_s30, %s2522_s18  }
  0x23   : > { %s2485_s23 = scalar_lea.vmem %s418_s22, 2048  ;;  %p2493_p0 = scmp.lt.s32.totalorder %s418_s22, %s418_s22 }
  0x24   : > { %p2486_p11 = scmp.ne.s32.totalorder %s418_s22, %s2485_s23  ;;  %p2494_p1 = scmp.lt.s32.totalorder %s2485_s23, %s2485_s23 }
  0x26   : > { %p2488_p12 = pnand %p2486_p11, %p2424_p6  ;;  %p2495_p4 = por %p2494_p1, %p2493_p0 }
  0x28   : > { %p2489_p13 = pneg %p2488_p12 }
  0x2a   : > { %p2496_p7 = pnand %p2495_p4, %p2489_p13 }
  0x2c   : > { %2499 = shalt.err (!%p2496_p7)
}
  0x2d   : > { %2298 = dma.hbm_to_vmem [thread:$0]  (!%p2625_p5), %s2941_s10, 2048, %s418_s22, [#allocation5], %s2521_s30, %s2521_s30, %s2522_s18  }
  0x2e   : > { %455 = sbr.rel (%p2615_p3) target bundleno = 3913 (0xf49), region = 76 }
  0x33   : > { %2505 = dma.done.wait (%p2299_p2), [#allocation3], 1024  }
  0x34   : > { %2507 = vsyncadd (%p2299_p2), [#allocation3], 4294966272 }
  0x35   : > { %2509 = dma.done.wait (%p2299_p2), [#allocation5], 4096  }
  0x36   : > { %2511 = vsyncadd (%p2299_p2), [#allocation5], 4294963200  ;;  %v2523_v0 = vmov 0.0   ;;  %vm2524_vm0 = vmmov 0   ;;  %v2326_v1 = vld [vmem:[%s2933_s2 + $0x78] sm:$0xff]   ;;  %v2328_v3 = vld [vmem:[%s2933_s2 + $0x70] sm:$0xff]  }
  0x37   : > { %2169 = vmatprep.subr.bf16.mxu1 %v2523_v0  ;;  %2149 = vmatprep.subr.bf16.mxu0 %v2523_v0  ;;  %v2327_v2 = vld [vmem:[%s2933_s2 + $0x38] sm:$0xff]   ;;  %v2329_v4 = vld [vmem:[%s2933_s2 + $0x30] sm:$0xff]   ;;  %v2330_v5 = vld [vmem:[%s2933_s2 + $0x68] sm:$0xff]   ;;  %p510_p2 = scmp.lt.s32.totalorder %s2610_s16, 1  ;;  %vm865_vm1 = vcmask 261120   ;;  %s2525_s25 = smov 96  }
  0x38   : > { %2185 = vmatprep.mubr.msk.bf16.mxu1 %vm2524_vm0, %v2523_v0  ;;  %2165 = vmatprep.mubr.msk.bf16.mxu0 %vm2524_vm0, %v2523_v0  ;;  %v2331_v6 = vld [vmem:[%s2933_s2 + $0x28] sm:$0xff]   ;;  %v2332_v7 = vld [vmem:[%s2933_s2 + $0x60] sm:$0xff]   ;;  %v2334_v9 = vld [vmem:[%s2933_s2 + $0x58] sm:$0xff]   ;;  %vm920_vm2 = vcmask 64512   ;;  %vm936_vm3 = vcmask 1043456   ;;  %s2526_s21 = smov 64  }
  0x39   : > { %2170 = vmatpush3.bf16.msra.mxu1 %v2326_v1  ;;  %2150 = vmatpush3.bf16.msra.mxu0 %v2327_v2  ;;  %v2333_v8 = vld [vmem:[%s2933_s2 + $0x20] sm:$0xff]   ;;  %s2949_s16 = smov (!%p510_p2, %s2610_s16), 1  ;;  %v2335_v10 = vld [vmem:[%s2933_s2 + $0x18] sm:$0xff]   ;;  %v2336_v11 = vld [vmem:[%s2933_s2 + $0x50] sm:$0xff]   ;;  %s2527_s23 = smov 32   ;;  %vm1332_vm4 = vcmask 523264  }
  0x3a   : > { %2171 = vmatprep.subr.bf16.mxu1 %v2523_v0  ;;  %2151 = vmatprep.subr.bf16.mxu0 %v2523_v0  ;;  %s1955_s18 = sshll.u32 %s2949_s16, 3  ;;  %v2337_v12 = vld [vmem:[%s2933_s2 + $0x10] sm:$0xff]   ;;  %v2338_v13 = vld [vmem:[%s2933_s2 + $0x48] sm:$0xff]   ;;  %v2340_v15 = vld [vmem:[%s2933_s2 + $0x40] sm:$0xff]   ;;  %s516_s28 = scalar_lea.vmem %s2932_s1, %s2949_s16  ;;  %vm1334_vm5 = vcmask 785408  }
  0x3b   : > { %v2339_v14 = vld [vmem:[%s2933_s2 + $0x8] sm:$0xff]   ;;  %s513_s22 = scalar_lea.vmem %s2931_s0, %s1955_s18  ;;  %v2341_v17 = vld [vmem:[%s2933_s2] sm:$0xff]   ;;  %v2342_v34 = vld [vmem:[%s2933_s2 + $0xb8] sm:$0xff]   ;;  %s520_s19 = scalar_lea.vmem %s2945_s14, %s1955_s18 }
  0x3c   : > { %v2746_v16 = vld [vmem:[%s513_s22] sm:$0xff]  ;;  %v2343_v35 = vld [vmem:[%s2933_s2 + $0xb0] sm:$0xff]   ;;  %v2344_v36 = vld [vmem:[%s2933_s2 + $0xa8] sm:$0xff]  }
  0x3d   : > { %2172 = vmatpush3.bf16.msra.mxu1 %v2328_v3  ;;  %2152 = vmatpush3.bf16.msra.mxu0 %v2329_v4  ;;  %v523_v18 = vpack.c.bf16 %v2746_v16, %v2746_v16  ;;  %v1983_v19 = vld [vmem:[%s2934_s3 + $0x1] ss:$0 sm:$0xff]  ;;  %v1957_v20 = vld [vmem:[%s2934_s3] ss:$0 sm:$0xff]  ;;  %v2346_v38 = vld [vmem:[%s2933_s2 + $0x98] sm:$0xff]  }
  0x3e   : > { %2173 = vmatprep.subr.bf16.mxu1 %v2523_v0  ;;  %2153 = vmatprep.subr.bf16.mxu0 %v2523_v0  ;;  %v2345_v37 = vld [vmem:[%s2933_s2 + $0xa0] sm:$0xff]   ;;  %v2347_v39 = vld [vmem:[%s2933_s2 + $0x90] sm:$0xff]   ;;  %v2348_v40 = vld [vmem:[%s2933_s2 + $0x88] sm:$0xff]  }
  0x3f   : > { %v2349_v41 = vld [vmem:[%s2933_s2 + $0x80] sm:$0xff]  }
  0x40   : > { %v2820_v43 = vld [vmem:[%s516_s28] ss:$0 sm:$0xff]  ;;  %v2009_v55 = vld [vmem:[%s2934_s3 + $0x2] ss:$0 sm:$0xff] }
  0x41   : > { %2174 = vmatpush3.bf16.msra.mxu1 %v2330_v5  ;;  %2154 = vmatpush3.bf16.msra.mxu0 %v2331_v6 }
  0x42   : > { %2175 = vmatprep.subr.bf16.mxu1 %v2523_v0  ;;  %2155 = vmatprep.subr.bf16.mxu0 %v2523_v0 }
  0x45   : > { %2176 = vmatpush3.bf16.msra.mxu1 %v2332_v7  ;;  %2156 = vmatpush3.bf16.msra.mxu0 %v2333_v8 }
  0x46   : > { %2177 = vmatprep.subr.bf16.mxu1 %v2523_v0  ;;  %2157 = vmatprep.subr.bf16.mxu0 %v2523_v0 }
  0x49   : > { %2178 = vmatpush3.bf16.msra.mxu1 %v2334_v9  ;;  %2158 = vmatpush3.bf16.msra.mxu0 %v2335_v10 }
  0x4a   : > { %2179 = vmatprep.subr.bf16.mxu1 %v2523_v0  ;;  %2159 = vmatprep.subr.bf16.mxu0 %v2523_v0 }
  0x4d   : > { %2180 = vmatpush3.bf16.msra.mxu1 %v2336_v11  ;;  %2160 = vmatpush3.bf16.msra.mxu0 %v2337_v12 }
  0x4e   : > { %2181 = vmatprep.subr.bf16.mxu1 %v2523_v0  ;;  %2161 = vmatprep.subr.bf16.mxu0 %v2523_v0 }
  0x51   : > { %2182 = vmatpush3.bf16.msra.mxu1 %v2338_v13  ;;  %2162 = vmatpush3.bf16.msra.mxu0 %v2339_v14 }
  0x52   : > { %2183 = vmatprep.subr.bf16.mxu1 %v2523_v0  ;;  %2163 = vmatprep.subr.bf16.mxu0 %v2523_v0 }
  0x55   : > { %2184 = vmatpush3.bf16.msra.mxu1 %v2340_v15  ;;  %2164 = vmatpush3.bf16.msra.mxu0 %v2341_v17 }
  0x56   : > { %2209 = vmatprep.subr.bf16.mxu1 %v2523_v0  ;;  %2189 = vmatprep.subr.bf16.mxu0 %v2523_v0 }
  0x58   : > { %2186 = vmatmul.mubr.bf16.vlgmr.msra.gmra.mxu1 %v523_v18  ;;  %2166 = vmatmul.mubr.bf16.vlgmr.msra.gmra.mxu0 %v523_v18 }
  0x59   : > { %2211 = vmatprep.mubr.msk.bf16.mxu1 %vm2524_vm0, %v2523_v0  ;;  %2205 = vmatprep.mubr.msk.bf16.mxu0 %vm2524_vm0, %v2523_v0 }
  0x5a   : > { %2190 = vmatpush3.bf16.msra.mxu0 %v2342_v34 }
  0x5b   : > { %2191 = vmatprep.subr.bf16.mxu0 %v2523_v0 }
  0x5e   : > { %2192 = vmatpush3.bf16.msra.mxu0 %v2343_v35 }
  0x5f   : > { %2193 = vmatprep.subr.bf16.mxu0 %v2523_v0 }
  0x62   : > { %2194 = vmatpush3.bf16.msra.mxu0 %v2344_v36 }
  0x63   : > { %2195 = vmatprep.subr.bf16.mxu0 %v2523_v0 }
  0x66   : > { %2196 = vmatpush3.bf16.msra.mxu0 %v2345_v37 }
  0x67   : > { %2197 = vmatprep.subr.bf16.mxu0 %v2523_v0 }
  0x6a   : > { %2198 = vmatpush3.bf16.msra.mxu0 %v2346_v38 }
  0x6b   : > { %2199 = vmatprep.subr.bf16.mxu0 %v2523_v0 }
  0x6e   : > { %2200 = vmatpush3.bf16.msra.mxu0 %v2347_v39 }
  0x6f   : > { %2201 = vmatprep.subr.bf16.mxu0 %v2523_v0 }
  0x72   : > { %2202 = vmatpush3.bf16.msra.mxu0 %v2348_v40 }
  0x73   : > { %2203 = vmatprep.subr.bf16.mxu0 %v2523_v0 }
  0x76   : > { %2204 = vmatpush3.bf16.msra.mxu0 %v2349_v41 }
  0x77   : > { %2257 = vmatprep.subr.bf16.mxu0 %v2523_v0 }
  0x79   : > { %2206 = vmatmul.mubr.bf16.vlgmr.msra.gmra.mxu0 %v523_v18 }
  0x7a   : > { %2273 = vmatprep.mubr.msk.bf16.mxu0 %vm2524_vm0, %v2523_v0 }
 0x118   : > { %v743_v21 = vpop.f32.mrf.mxu1  ;;  %v630_v23 = vpop.f32.mrf.mxu0 }
 0x119   : > { %v744_v22 = vadd.f32 %v1983_v19, %v743_v21  ;;  %v631_v25 = vadd.f32 %v1957_v20, %v630_v23 }
 0x11a   : > { %v2187_v24 = vpop.f32.mrf.mxu1  ;;  %v2167_v27 = vpop.f32.mrf.mxu0 }
 0x11b   : > { %v2767_v26 = vpack.c.bf16 %v744_v22, %v744_v22  ;;  %v2769_v29 = vpack.c.bf16 %v631_v25, %v631_v25 }
 0x11c   : > { %v746_v28 = vpop.f32.mrf.mxu1  ;;  %v633_v31 = vpop.f32.mrf.mxu0 }
 0x11d   : > { %984 = vrot.lane.b32.xlu1 %v2767_v26, %s2525_s25  ;;  %v870_v30 = vsel %vm865_vm1, %v2767_v26, 0 }
 0x11e   : > { %v2188_v32 = vpop.f32.mrf.mxu1  ;;  %2210 = vmatpush3.bf16.xpose.msra.mxu1 %v870_v30  ;;  %v2168_v33 = vpop.f32.mrf.mxu0 }
 0x11f   : > { %2215 = vmatprep.subr.bf16.mxu1 %v2523_v0 }
 0x121   : > { %981 = vrot.lane.b32.xlu1 %v2769_v29, %s2525_s25 }
 0x125   : > { %2212 = vmatmul.mubr.msk.bf16.vlgmr.msra.gmra.mxu1 %vm865_vm1, %v2769_v29 }
 0x126   : > { %2217 = vmatprep.mubr.msk.bf16.mxu1 %vm2524_vm0, %v2523_v0 }
 0x139   : > { %v856_v56 = vpop.f32.mrf.mxu0 }
 0x13a   : > { %v857_v57 = vadd.f32 %v2009_v55, %v856_v56 }
 0x13b   : > { %v2207_v58 = vpop.f32.mrf.mxu0 }
 0x13c   : > { %v2828_v59 = vpack.c.bf16 %v857_v57, %v857_v57 }
 0x13d   : > { %v859_v60 = vpop.f32.mrf.mxu0 }
 0x13e   : > { %v938_v61 = vsel %vm936_vm3, %v2828_v59, 0 }
 0x13f   : > { %v2208_v62 = vpop.f32.mrf.mxu0  ;;  %2216 = vmatpush3.bf16.msra.mxu1 %v938_v61 }
 0x140   : > { %2221 = vmatprep.subr.bf16.mxu1 %v2523_v0 }
 0x18f   : > { %v985_v3 = vpop.permute.xlu1 %984 }
 0x190   : > { %v990_v5 = vsel %vm865_vm1, %v985_v3, 0 }
 0x193   : > { %v982_v6 = vpop.permute.xlu1 %981 }
 0x1e5   : > { %v906_v42 = vpop.f32.mrf.mxu1 }
 0x1e6   : > { %v912_v44 = vmul.f32 0.17677669, %v906_v42 }
 0x1e7   : > { %v2213_v45 = vpop.f32.mrf.mxu1 }
 0x1e8   : > { %v919_v46 = vadd.f32 %v2820_v43, %v912_v44 }
 0x1e9   : > { %v909_v47 = vpop.f32.mrf.mxu1 }
 0x1ea   : > { %v921_v48 = vsel %vm920_vm2, %v919_v46, -inf }
 0x1eb   : > { %922 = vmax.xlane.f32.xlu0 %v921_v48  ;;  %v2214_v49 = vpop.f32.mrf.mxu1 }
 0x274   : > { %v923_v50 = vpop.xlane.xlu0 %922 }
 0x275   : > { %v924_v51 = vsub.f32 %v919_v46, %v923_v50 }
 0x277   : > { %v925_v52 = vmul.f32 1.442695, %v924_v51 }
 0x279   : > { %2398 = vpow2.f32 %v925_v52 }
 0x286   : > { %v2399_v53 = vpop.eup %2398 }
 0x287   : > { %v927_v54 = vsel %vm920_vm2, %v2399_v53, 0.0 }
 0x288   : > { %928 = vadd.xlane.f32.xlu0 %v927_v54 }
 0x311   : > { %v929_v63 = vpop.xlane.xlu0 %928 }
 0x312   : > { %2400 = vrcp.f32 %v929_v63 }
 0x31f   : > { %v2401_v1 = vpop.eup %2400 }
 0x320   : > { %v931_v2 = vmul.f32 %v2401_v1, %v2399_v53 }
 0x322   : > { %v932_v4 = vpack.c.bf16 %v931_v2, %v931_v2 }
 0x324   : > { %2218 = vmatmul.mubr.msk.bf16.vlgmr.msra.gmra.mxu1 %vm920_vm2, %v932_v4 }
 0x325   : > { %2222 = vmatpush3.bf16.xpose.msra.mxu1 %v990_v5  ;;  %2223 = vmatprep.mubr.msk.bf16.mxu1 %vm2524_vm0, %v2523_v0 }
 0x326   : > { %2227 = vmatprep.subr.bf16.mxu1 %v2523_v0 }
 0x32c   : > { %2224 = vmatmul.mubr.msk.bf16.vlgmr.msra.gmra.mxu1 %vm865_vm1, %v982_v6 }
 0x32d   : > { %2229 = vmatprep.mubr.msk.bf16.mxu1 %vm2524_vm0, %v2523_v0 }
 0x3e4   : > { %v2841_v7 = vpop.f32.mrf.mxu1 }
 0x3e6   : > { %v2219_v8 = vpop.f32.mrf.mxu1 }
 0x3e8   : > { %v977_v9 = vpop.f32.mrf.mxu1 }
 0x3ea   : > { %v2220_v10 = vpop.f32.mrf.mxu1 }
 0x3ec   : > { %v1026_v11 = vpop.f32.mrf.mxu1 }
 0x3ed   : > { %v1032_v12 = vmul.f32 0.17677669, %v1026_v11 }
 0x3ee   : > { %v2225_v13 = vpop.f32.mrf.mxu1 }
 0x3ef   : > { %v1033_v14 = vadd.f32 %v2820_v43, %v1032_v12 }
 0x3f0   : > { %v1029_v15 = vpop.f32.mrf.mxu1 }
 0x3f1   : > { %v1034_v17 = vsel %vm920_vm2, %v1033_v14, -inf }
 0x3f2   : > { %1035 = vmax.xlane.f32.xlu0 %v1034_v17  ;;  %v2226_v18 = vpop.f32.mrf.mxu1 }
 0x408   : > { %1047 = vrot.lane.b32.xlu0 %v2828_v59, %s2525_s25 }
 0x40c   : > { %1097 = vrot.lane.b32.xlu0 %v2767_v26, %s2526_s21 }
 0x410   : > { %1095 = vrot.lane.b32.xlu0 %v2769_v29, %s2526_s21 }
 0x47b   : > { %v1036_v19 = vpop.xlane.xlu0 %1035 }
 0x47c   : > { %v1037_v20 = vsub.f32 %v1033_v14, %v1036_v19  ;;  %v2350_v19 = vld [vmem:[#allocation2 + $0x38] sm:$0xff]  }
 0x47d   : > { %2258 = vmatpush3.bf16.msra.mxu0 %v2350_v19  ;;  %v2389_v19 = vld [vmem:[#allocation6 + $0x20] sm:$0xff]  }
 0x47e   : > { %v1038_v21 = vmul.f32 1.442695, %v1037_v20  ;;  %v2351_v20 = vld [vmem:[#allocation2 + $0x30] sm:$0xff]   ;;  %2259 = vmatprep.subr.bf16.mxu0 %v2523_v0 }
 0x47f   : > { %v1048_v22 = vpop.permute.xlu0 %1047 }
 0x480   : > { %2402 = vpow2.f32 %v1038_v21  ;;  %v1053_v23 = vsel %vm936_vm3, %v1048_v22, 0  ;;  %v2352_v21 = vld [vmem:[#allocation2 + $0x28] sm:$0xff]   ;;  %v2353_v22 = vld [vmem:[#allocation2 + $0x20] sm:$0xff]  }
 0x481   : > { %2228 = vmatpush3.bf16.msra.mxu1 %v1053_v23  ;;  %2260 = vmatpush3.bf16.msra.mxu0 %v2351_v20  ;;  %v2354_v23 = vld [vmem:[#allocation2 + $0x18] sm:$0xff]  }
 0x482   : > { %2233 = vmatprep.subr.bf16.mxu1 %v2523_v0  ;;  %2261 = vmatprep.subr.bf16.mxu0 %v2523_v0  ;;  %v2390_v20 = vld [vmem:[#allocation6 + $0x58] sm:$0xff]  }
 0x483   : > { %v1098_v31 = vpop.permute.xlu0 %1097 }
 0x484   : > { %v1103_v33 = vsel %vm865_vm1, %v1098_v31, 0 }
 0x485   : > { %2262 = vmatpush3.bf16.msra.mxu0 %v2352_v21  ;;  %v2391_v21 = vld [vmem:[#allocation6 + $0x18] sm:$0xff]  }
 0x486   : > { %2263 = vmatprep.subr.bf16.mxu0 %v2523_v0 }
 0x487   : > { %v1096_v35 = vpop.permute.xlu0 %1095 }
 0x489   : > { %2264 = vmatpush3.bf16.msra.mxu0 %v2353_v22  ;;  %v2392_v22 = vld [vmem:[#allocation6 + $0x50] sm:$0xff]  }
 0x48a   : > { %2265 = vmatprep.subr.bf16.mxu0 %v2523_v0 }
 0x48d   : > { %v2403_v24 = vpop.eup %2402  ;;  %2266 = vmatpush3.bf16.msra.mxu0 %v2354_v23  ;;  %v2393_v23 = vld [vmem:[#allocation6 + $0x10] sm:$0xff]  }
 0x48e   : > { %v1040_v25 = vsel %vm920_vm2, %v2403_v24, 0.0  ;;  %2267 = vmatprep.subr.bf16.mxu0 %v2523_v0 }
 0x48f   : > { %1041 = vadd.xlane.f32.xlu1 %v1040_v25  ;;  %v2356_v25 = vld [vmem:[#allocation2 + $0x8] sm:$0xff]  }
 0x4a0   : > { %1159 = vrot.lane.b32.xlu1 %v2828_v59, %s2526_s21 }
 0x518   : > { %v1042_v27 = vpop.xlane.xlu1 %1041 }
 0x519   : > { %2404 = vrcp.f32 %v1042_v27  ;;  %v2357_v27 = vld [vmem:[#allocation2] sm:$0xff]  }
 0x51c   : > { %v1160_v34 = vpop.permute.xlu1 %1159 }
 0x51d   : > { %v1165_v36 = vsel %vm936_vm3, %v1160_v34, 0 }
 0x526   : > { %v2405_v28 = vpop.eup %2404 }
 0x527   : > { %v1044_v30 = vmul.f32 %v2405_v28, %v2403_v24  ;;  %v2355_v24 = vld [vmem:[#allocation2 + $0x10] sm:$0xff]  }
 0x528   : > { %2268 = vmatpush3.bf16.msra.mxu0 %v2355_v24  ;;  %v2394_v24 = vld [vmem:[#allocation6 + $0x48] sm:$0xff]  }
 0x529   : > { %v1045_v32 = vpack.c.bf16 %v1044_v30, %v1044_v30  ;;  %2269 = vmatprep.subr.bf16.mxu0 %v2523_v0 }
 0x52b   : > { %2230 = vmatmul.mubr.msk.bf16.vlgmr.msra.gmra.mxu1 %vm920_vm2, %v1045_v32 }
 0x52c   : > { %2234 = vmatpush3.bf16.xpose.msra.mxu1 %v1103_v33  ;;  %2235 = vmatprep.mubr.msk.bf16.mxu1 %vm2524_vm0, %v2523_v0 }
 0x52d   : > { %2239 = vmatprep.subr.bf16.mxu1 %v2523_v0  ;;  %2270 = vmatpush3.bf16.msra.mxu0 %v2356_v25  ;;  %v2395_v25 = vld [vmem:[#allocation6 + $0x8] sm:$0xff]  }
 0x52e   : > { %2271 = vmatprep.subr.bf16.mxu0 %v2523_v0 }
 0x531   : > { %2272 = vmatpush3.bf16.msra.mxu0 %v2357_v27  ;;  %v2396_v27 = vld [vmem:[#allocation6 + $0x40] sm:$0xff]  }
 0x533   : > { %2236 = vmatmul.mubr.msk.bf16.vlgmr.msra.gmra.mxu1 %vm865_vm1, %v1096_v35 }
 0x534   : > { %2240 = vmatpush3.bf16.msra.mxu1 %v1165_v36  ;;  %2241 = vmatprep.mubr.msk.bf16.mxu1 %vm2524_vm0, %v2523_v0 }
 0x535   : > { %2245 = vmatprep.subr.bf16.mxu1 %v2523_v0 }
 0x5eb   : > { %v1089_v37 = vpop.f32.mrf.mxu1 }
 0x5ed   : > { %v2231_v38 = vpop.f32.mrf.mxu1 }
 0x5ef   : > { %v1092_v39 = vpop.f32.mrf.mxu1 }
 0x5f1   : > { %v2232_v40 = vpop.f32.mrf.mxu1 }
 0x5f3   : > { %v1139_v41 = vpop.f32.mrf.mxu1 }
 0x5f4   : > { %v1145_v42 = vmul.f32 0.17677669, %v1139_v41 }
 0x5f5   : > { %v2237_v44 = vpop.f32.mrf.mxu1 }
 0x5f6   : > { %v1146_v45 = vadd.f32 %v2820_v43, %v1145_v42 }
 0x5f7   : > { %v1142_v46 = vpop.f32.mrf.mxu1 }
 0x5f8   : > { %v1147_v47 = vsel %vm920_vm2, %v1146_v45, -inf }
 0x5f9   : > { %1148 = vmax.xlane.f32.xlu0 %v1147_v47  ;;  %v2238_v48 = vpop.f32.mrf.mxu1  ;;  %v2358_v47 = vld [vmem:[#allocation4 + $0x70] ss:$8 sps:$4 sm:$0xff]  }
 0x5fa   : > { %v2360_v48 = vld [vmem:[#allocation4 + $0x74] ss:$8 sps:$4 sm:$0xff]  }
 0x682   : > { %v1149_v49 = vpop.xlane.xlu0 %1148 }
 0x683   : > { %v1150_v50 = vsub.f32 %v1146_v45, %v1149_v49  ;;  %v2361_v49 = vld [vmem:[#allocation4 + $0x60] ss:$8 sps:$4 sm:$0xff]  }
 0x685   : > { %v1151_v51 = vmul.f32 1.442695, %v1150_v50 }
 0x687   : > { %2406 = vpow2.f32 %v1151_v51 }
 0x694   : > { %v2407_v52 = vpop.eup %2406 }
 0x695   : > { %v1153_v53 = vsel %vm920_vm2, %v2407_v52, 0.0 }
 0x696   : > { %1154 = vadd.xlane.f32.xlu1 %v1153_v53 }
 0x6a7   : > { %1209 = vrot.lane.b32.xlu1 %v2767_v26, %s2527_s23 }
 0x6ab   : > { %1207 = vrot.lane.b32.xlu1 %v2769_v29, %s2527_s23 }
 0x71f   : > { %v1155_v54 = vpop.xlane.xlu1 %1154 }
 0x720   : > { %2408 = vrcp.f32 %v1155_v54  ;;  %v2366_v54 = vld [vmem:[#allocation4 + $0x54] ss:$8 sps:$4 sm:$0xff]  }
 0x723   : > { %v1210_v57 = vpop.permute.xlu1 %1209 }
 0x724   : > { %v1215_v60 = vsel %vm865_vm1, %v1210_v57, 0  ;;  %v2372_v57 = vld [vmem:[#allocation4 + $0x34] ss:$8 sps:$4 sm:$0xff]  }
 0x727   : > { %v1208_v61 = vpop.permute.xlu1 %1207 }
 0x72d   : > { %v2409_v55 = vpop.eup %2408 }
 0x72e   : > { %v1157_v56 = vmul.f32 %v2409_v55, %v2407_v52  ;;  %v2364_v55 = vld [vmem:[#allocation4 + $0x50] ss:$8 sps:$4 sm:$0xff]  }
 0x730   : > { %v1158_v58 = vpack.c.bf16 %v1157_v56, %v1157_v56  ;;  %v2369_v56 = vld [vmem:[#allocation4 + $0x44] ss:$8 sps:$4 sm:$0xff]  }
 0x732   : > { %2242 = vmatmul.mubr.msk.bf16.vlgmr.msra.gmra.mxu1 %vm920_vm2, %v1158_v58  ;;  %v2370_v58 = vld [vmem:[#allocation4 + $0x30] ss:$8 sps:$4 sm:$0xff]  }
 0x733   : > { %2246 = vmatpush3.bf16.xpose.msra.mxu1 %v1215_v60  ;;  %2247 = vmatprep.mubr.msk.bf16.mxu1 %vm2524_vm0, %v2523_v0  ;;  %v2528_v60 = vmov 0  }
 0x734   : > { %2251 = vmatprep.subr.bf16.mxu1 %v2523_v0 }
 0x73a   : > { %2248 = vmatmul.mubr.msk.bf16.vlgmr.msra.gmra.mxu1 %vm865_vm1, %v1208_v61  ;;  %v2375_v61 = vld [vmem:[#allocation4 + $0x24] ss:$8 sps:$4 sm:$0xff]  }
 0x73b   : > { %2253 = vmatprep.mubr.msk.bf16.mxu1 %vm2524_vm0, %v2523_v0  ;;  %v2027_v0 = vld [vmem:[%s2936_s5] ss:$0 sm:$0xff] }
 0x7f2   : > { %v1201_v26 = vpop.f32.mrf.mxu1 }
 0x7f4   : > { %v2243_v29 = vpop.f32.mrf.mxu1 }
 0x7f5   : > { %v2378_v29 = vld [vmem:[#allocation4 + $0x14] ss:$8 sps:$4 sm:$0xff]  }
 0x7f6   : > { %v1204_v62 = vpop.f32.mrf.mxu1 }
 0x7f7   : > { %v2376_v62 = vld [vmem:[#allocation4 + $0x10] ss:$8 sps:$4 sm:$0xff]  }
 0x7f8   : > { %v2244_v63 = vpop.f32.mrf.mxu1 }
 0x7f9   : > { %v2381_v63 = vld [vmem:[#allocation4 + $0x4] ss:$8 sps:$4 sm:$0xff]  }
 0x7fa   : > { %v1251_v1 = vpop.f32.mrf.mxu1 }
 0x7fb   : > { %v1257_v2 = vmul.f32 0.17677669, %v1251_v1  ;;  %v2379_v1 = vld [vmem:[#allocation4] ss:$8 sps:$4 sm:$0xff]  }
 0x7fc   : > { %v2249_v3 = vpop.f32.mrf.mxu1 }
 0x7fd   : > { %v1258_v4 = vadd.f32 %v2820_v43, %v1257_v2 }
 0x7fe   : > { %v1254_v5 = vpop.f32.mrf.mxu1 }
 0x7ff   : > { %v1259_v6 = vsel %vm920_vm2, %v1258_v4, -inf }
 0x800   : > { %1260 = vmax.xlane.f32.xlu0 %v1259_v6  ;;  %v2250_v8 = vpop.f32.mrf.mxu1  ;;  %v2036_v6 = vld [vmem:[%s2937_s6] ss:$0 sm:$0xff] }
 0x816   : > { %1271 = vrot.lane.b32.xlu0 %v2828_v59, %s2527_s23 }
 0x81a   : > { %1320 = vrot.lane.b32.xlu0 %v1089_v37, %s2527_s23 }
 0x81e   : > { %1324 = vrot.lane.b32.xlu0 %v1201_v26, %s2526_s21  ;;  %v2373_v26 = vld [vmem:[#allocation4 + $0x20] ss:$8 sps:$4 sm:$0xff]  }
 0x889   : > { %v1261_v9 = vpop.xlane.xlu0 %1260 }
 0x88a   : > { %v1262_v10 = vsub.f32 %v1258_v4, %v1261_v9  ;;  %v2037_v9 = vld [vmem:[%s2938_s7] ss:$0 sm:$0xff] }
 0x88c   : > { %v1263_v11 = vmul.f32 1.442695, %v1262_v10 }
 0x88d   : > { %v1272_v12 = vpop.permute.xlu0 %1271 }
 0x88e   : > { %2410 = vpow2.f32 %v1263_v11  ;;  %v1277_v13 = vsel %vm936_vm3, %v1272_v12, 0 }
 0x88f   : > { %2252 = vmatpush3.bf16.msra.mxu1 %v1277_v13  ;;  %v2382_v13 = vld [vmem:[#allocation6 + $0x78] sm:$0xff]  }
 0x890   : > { %1586 = vmatprep.subr.bf16.mxu1 %v2360_v48  ;;  %2127 = vmatprep.subr.bf16.mxu0 %v2382_v13 }
 0x891   : > { %v1321_v33 = vpop.permute.xlu0 %1320 }
 0x892   : > { %v1331_v35 = vsel %vm865_vm1, %v2841_v7, %v1321_v33  ;;  %v2363_v7 = vld [vmem:[#allocation4 + $0x64] ss:$8 sps:$4 sm:$0xff]   ;;  %v1494_v33 = vld [vmem:[%s2940_s9] sm:$0x3] }
 0x895   : > { %v1325_v34 = vpop.permute.xlu0 %1324 }
 0x896   : > { %v1333_v36 = vsel %vm1332_vm4, %v1331_v35, %v1325_v34 }
 0x89b   : > { %v2411_v14 = vpop.eup %2410 }
 0x89c   : > { %v1265_v43 = vsel %vm920_vm2, %v2411_v14, 0.0 }
 0x89d   : > { %1266 = vadd.xlane.f32.xlu1 %v1265_v43  ;;  %v2384_v43 = vld [vmem:[#allocation6 + $0x70] sm:$0xff]  }
 0x926   : > { %v1267_v15 = vpop.xlane.xlu1 %1266 }
 0x927   : > { %2412 = vrcp.f32 %v1267_v15  ;;  %v2385_v15 = vld [vmem:[#allocation6 + $0x30] sm:$0xff]  }
 0x934   : > { %v2413_v17 = vpop.eup %2412 }
 0x935   : > { %v1269_v18 = vmul.f32 %v2413_v17, %v2411_v14  ;;  %v2383_v14 = vld [vmem:[#allocation6 + $0x38] sm:$0xff]   ;;  %v2386_v17 = vld [vmem:[#allocation6 + $0x68] sm:$0xff]  }
 0x937   : > { %v1270_v59 = vpack.c.bf16 %v1269_v18, %v1269_v18  ;;  %v2387_v18 = vld [vmem:[#allocation6 + $0x28] sm:$0xff]  }
 0x939   : > { %2254 = vmatmul.mubr.msk.bf16.vlgmr.msra.gmra.mxu1 %vm920_vm2, %v1270_v59  ;;  %v2388_v59 = vld [vmem:[#allocation6 + $0x60] sm:$0xff]  }
 0x93a   : > { %1587 = vmatpush1.bf16.msra.mxu1 %v2358_v47  ;;  %1618 = vmatprep.mubr.bf16.mxu1 %v2528_v60 }
 0x93b   : > { %1588 = vmatprep.subr.bf16.mxu1 %v2363_v7 }
 0x93e   : > { %1589 = vmatpush1.bf16.msra.mxu1 %v2361_v49 }
 0x93f   : > { %1590 = vmatprep.subr.bf16.mxu1 %v2366_v54 }
 0x942   : > { %1591 = vmatpush1.bf16.msra.mxu1 %v2364_v55 }
 0x943   : > { %1592 = vmatprep.subr.bf16.mxu1 %v2369_v56 }
 0x9f9   : > { %v1313_v28 = vpop.f32.mrf.mxu1 }
 0x9fa   : > { %1328 = vrot.lane.b32.xlu0 %v1313_v28, %s2525_s25  ;;  %v2397_v28 = vld [vmem:[#allocation6] sm:$0xff]  }
 0x9fb   : > { %v2255_v30 = vpop.f32.mrf.mxu1 }
 0x9fc   : > { %v1496_v30 = vlaneseq }
 0x9fd   : > { %v1316_v31 = vpop.f32.mrf.mxu1 }
 0x9fe   : > { %v1497_v31 = vshrl.u32 %v1496_v30, 7 }
 0x9ff   : > { %v2256_v32 = vpop.f32.mrf.mxu1 }
 0xa00   : > { %v1498_v32 = vsub.s32 0, %v1497_v31  ;;  %v1502_v34 = vsub.s32 1, %v1497_v31 }
 0xa02   : > { %v1499_v35 = vrot.slane %v1494_v33, %v1498_v32 }
 0xa6c   : > { %v1329_v37 = vpop.permute.xlu0 %1328 }
 0xa6d   : > { %v1335_v38 = vsel %vm1334_vm5, %v1333_v36, %v1329_v37  ;;  %v1503_v36 = vrot.slane %v1494_v33, %v1502_v34 }
 0xa6e   : > { %v1336_v39 = vpack.c.bf16 %v1335_v38, %v1335_v38 }
 0xa70   : > { %2274 = vmatmul.mubr.bf16.vlgmr.msra.gmra.mxu0 %v1336_v39 }
 0xa71   : > { %2128 = vmatpush3.bf16.msra.mxu0 %v2383_v14 }
 0xa72   : > { %2129 = vmatprep.subr.bf16.mxu0 %v2384_v43  ;;  %v2071_v43 = vld [vmem:[%s2943_s12] ss:$0 sm:$0xff] }
 0xa75   : > { %2130 = vmatpush3.bf16.msra.mxu0 %v2385_v15 }
 0xa76   : > { %2131 = vmatprep.subr.bf16.mxu0 %v2386_v17 }
 0xa79   : > { %2132 = vmatpush3.bf16.msra.mxu0 %v2387_v18 }
 0xa7a   : > { %2133 = vmatprep.subr.bf16.mxu0 %v2388_v59 }
 0xa7d   : > { %2134 = vmatpush3.bf16.msra.mxu0 %v2389_v19 }
 0xa7e   : > { %2135 = vmatprep.subr.bf16.mxu0 %v2390_v20 }
 0xa81   : > { %2136 = vmatpush3.bf16.msra.mxu0 %v2391_v21 }
 0xa82   : > { %2137 = vmatprep.subr.bf16.mxu0 %v2392_v22 }
 0xa85   : > { %2138 = vmatpush3.bf16.msra.mxu0 %v2393_v23 }
 0xa86   : > { %2139 = vmatprep.subr.bf16.mxu0 %v2394_v24 }
 0xa89   : > { %2140 = vmatpush3.bf16.msra.mxu0 %v2395_v25 }
 0xa8a   : > { %2141 = vmatprep.subr.bf16.mxu0 %v2396_v27 }
 0xa8d   : > { %2142 = vmatpush3.bf16.msra.mxu0 %v2397_v28 }
 0xb30   : > { %v1442_v40 = vpop.f32.mrf.mxu0 }
 0xb31   : > { %v1443_v41 = vadd.f32 %v2027_v0, %v1442_v40 }
 0xb32   : > { %v2275_v42 = vpop.f32.mrf.mxu0 }
 0xb33   : > { %v1448_v44 = vadd.f32 %v1443_v41, %v2746_v16  ;;  %v2367_v16 = vld [vmem:[#allocation4 + $0x40] ss:$8 sps:$4 sm:$0xff]  }
 0xb34   : > { %v1445_v45 = vpop.f32.mrf.mxu0  ;;  %1593 = vmatpush1.bf16.msra.mxu1 %v2367_v16 }
 0xb35   : > { %1451 = vadd.xlane.f32.xlu1 %v1448_v44  ;;  %1594 = vmatprep.subr.bf16.mxu1 %v2372_v57 }
 0xb36   : > { %v2276_v46 = vpop.f32.mrf.mxu0 }
 0xb38   : > { %1595 = vmatpush1.bf16.msra.mxu1 %v2370_v58 }
 0xb39   : > { %1596 = vmatprep.subr.bf16.mxu1 %v2375_v61 }
 0xb3c   : > { %1597 = vmatpush1.bf16.msra.mxu1 %v2373_v26 }
 0xb3d   : > { %1598 = vmatprep.subr.bf16.mxu1 %v2378_v29  ;;  %v2054_v29 = vld [vmem:[%s2942_s11] ss:$0 sm:$0xff] }
 0xb40   : > { %1599 = vmatpush1.bf16.msra.mxu1 %v2376_v62 }
 0xb41   : > { %1600 = vmatprep.subr.bf16.mxu1 %v2381_v63 }
 0xb44   : > { %1601 = vmatpush1.bf16.msra.mxu1 %v2379_v1 }
 0xbbe   : > { %v1452_v50 = vpop.xlane.xlu1 %1451 }
 0xbbf   : > { %v1454_v51 = vmul.f32 0.0078125, %v1452_v50 }
 0xbc1   : > { %v1455_v52 = vsub.f32 %v1448_v44, %v1454_v51 }
 0xbc3   : > { %v1456_v53 = vmul.f32 %v1455_v52, %v1455_v52 }
 0xbc5   : > { %1457 = vadd.xlane.f32.xlu0 %v1456_v53 }
 0xc4e   : > { %v1458_v2 = vpop.xlane.xlu0 %1457 }
 0xc4f   : > { %v1459_v3 = vmul.f32 0.0078125, %v1458_v2 }
 0xc51   : > { %v1460_v4 = vadd.f32 1e-12, %v1459_v3 }
 0xc53   : > { %2414 = vrsqrt.f32 %v1460_v4 }
 0xc60   : > { %v2415_v5 = vpop.eup %2414 }
 0xc61   : > { %v1462_v8 = vmul.f32 %v2415_v5, %v1455_v52 }
 0xc63   : > { %v1469_v10 = vmul.f32 %v2036_v6, %v1462_v8 }
 0xc65   : > { %v2906_v11 = vadd.f32 %v2037_v9, %v1469_v10 }
 0xc67   : > { %v1477_v12 = vpack.c.bf16 %v2906_v11, %v2906_v11 }
 0xc69   : > { %1619 = vmatmul.mubr.bf16.vlgmr.msra.gmra.mxu1 %v1477_v12 }
 0xd29   : > { %v1620_v37 = vpop.f32.mrf.mxu1 }
 0xd2a   : > { %v1621_v38 = vadd.f32 %v1620_v37, %v1499_v35 }
 0xd2b   : > { %v1622_v39 = vpop.f32.mrf.mxu1 }
 0xd2c   : > { %v1629_v0 = vmul.f32 0.044715, %v1621_v38  ;;  %v1623_v40 = vadd.f32 %v1622_v39, %v1503_v36  ;;  %v1627_v55 = vmul.f32 0.5, %v1621_v38 }
 0xd2d   : > { %v1624_v41 = vpop.f32.mrf.mxu1 }
 0xd2e   : > { %v1631_v42 = vmul.f32 %v1629_v0, %v1621_v38  ;;  %v1630_v44 = vmul.f32 0.044715, %v1623_v40  ;;  %v1628_v16 = vmul.f32 0.5, %v1623_v40 }
 0xd2f   : > { %v1625_v45 = vpop.f32.mrf.mxu1 }
 0xd30   : > { %v1633_v46 = vmul.f32 %v1631_v42, %v1621_v38  ;;  %v1632_v47 = vmul.f32 %v1630_v44, %v1623_v40 }
 0xd32   : > { %v1635_v48 = vadd.f32 %v1633_v46, %v1621_v38  ;;  %v1634_v7 = vmul.f32 %v1632_v47, %v1623_v40 }
 0xd34   : > { %v1637_v49 = vmul.f32 0.7978846, %v1635_v48  ;;  %v1636_v50 = vadd.f32 %v1634_v7, %v1623_v40 }
 0xd36   : > { %v1638_v51 = vmul.f32 0.7978846, %v1636_v50  ;;  %2416 = vtanh.f32 %v1637_v49 }
 0xd38   : > { %2418 = vtanh.f32 %v1638_v51 }
 0xd43   : > { %v2417_v52 = vpop.eup %2416 }
 0xd44   : > { %v1641_v53 = vadd.f32 1.0, %v2417_v52 }
 0xd45   : > { %v2419_v54 = vpop.eup %2418 }
 0xd46   : > { %v1642_v56 = vadd.f32 1.0, %v2419_v54  ;;  %v1643_v57 = vmul.f32 %v1641_v53, %v1627_v55 }
 0xd48   : > { %v1644_v58 = vmul.f32 %v1642_v56, %v1628_v16  ;;  %v1645_v61 = vpack.c.bf16 %v1643_v57, %v1643_v57 }
 0xd4a   : > { %v1646_v60 = vpack.c.bf16 %v1644_v58, %v1644_v58 }
 0xd4c   : > { %1814 = vmatprep.mubr.bf16.mxu0 %v1646_v60 }
 0xd4d   : > { %1815 = vmatmul.mubr.bf16.vlgmr.msra.gmra.mxu0 %v1645_v61 }
 0xe0d   : > { %v2143_v26 = vpop.f32.mrf.mxu0 }
 0xe0f   : > { %v2144_v62 = vpop.f32.mrf.mxu0 }
 0xe10   : > { %v2145_v63 = vadd.f32 %v2144_v62, %v2143_v26 }
 0xe11   : > { %v2146_v1 = vpop.f32.mrf.mxu0 }
 0xe12   : > { %v1817_v2 = vadd.f32 %v2145_v63, %v2054_v29 }
 0xe13   : > { %v2147_v3 = vpop.f32.mrf.mxu0 }
 0xe14   : > { %v1822_v4 = vadd.f32 %v1817_v2, %v2906_v11  ;;  %v2072_v11 = vld [vmem:[%s2944_s13] ss:$0 sm:$0xff] }
 0xe16   : > { %1825 = vadd.xlane.f32.xlu1 %v1822_v4 }
 0xe9f   : > { %v1826_v5 = vpop.xlane.xlu1 %1825 }
 0xea0   : > { %v1827_v6 = vmul.f32 0.0078125, %v1826_v5 }
 0xea2   : > { %v1828_v8 = vsub.f32 %v1822_v4, %v1827_v6 }
 0xea4   : > { %v1829_v9 = vmul.f32 %v1828_v8, %v1828_v8 }
 0xea6   : > { %1830 = vadd.xlane.f32.xlu1 %v1829_v9 }
 0xf2f   : > { %v1831_v10 = vpop.xlane.xlu1 %1830 }
 0xf30   : > { %v1832_v12 = vmul.f32 0.0078125, %v1831_v10 }
 0xf32   : > { %v1833_v13 = vadd.f32 1e-12, %v1832_v12 }
 0xf34   : > { %2420 = vrsqrt.f32 %v1833_v13 }
 0xf41   : > { %v2421_v14 = vpop.eup %2420 }
 0xf42   : > { %v1835_v15 = vmul.f32 %v2421_v14, %v1828_v8 }
 0xf44   : > { %v1842_v17 = vmul.f32 %v2071_v43, %v1835_v15 }
 0xf46   : > { %v1849_v18 = vadd.f32 %v2072_v11, %v1842_v17 }
 0xf48   : > { %1850 = vst [vmem:[%s520_s19] sm:$0xff] %v1849_v18 }
 0xf49 PF: > { %s26_s29 = sadd.s32 1, %s2514_s29  }
 0xf4a   : > { %p23_p3 = scmp.ge.s32.totalorder %s26_s29, 4  }
 0xf4c   :  { %25 = sbr.rel (!%p23_p3) target bundleno = 2 (0x2), region = 126 }
 0xf51   :  { %1870 = vsyncpa [#allocation3], 1 }
 0xf52   :  { %1872 = vsyncpa [#allocation3 + $0x1], 1 }
 0xf53   :  { %1873 = vsyncpa [#allocation5], 1 }

</bundles_post_ra>
